<compile_context>
chip_gen: v7x
topology: tpu7x:2x2x1
jax: 0.10.0
libtpu: 0.0.40
codegen_flags: <defaults>
</compile_context>

<pallas_src>
import functools

import jax
import jax.numpy as jnp
from jax.experimental import pallas as pl
from jax.experimental.pallas import tpu as pltpu


# ----------------------------- fused Pallas kernel -----------------------------

def _ctfa_kernel(x_ref, r_ref, e_ref, m_ref,
                 tw1_ref, tb1_ref, tw2_ref, tb2_ref,
                 fw1_ref, fb1_ref, fw2_ref, fb2_ref,
                 o_ref):
    f32 = jnp.float32
    x = x_ref[0]                                                       # (C, D*T)

    # ---- time attention FA: mean over D -> conv1x1 -> ReLU -> conv1x1 -> sigmoid ----
    fa = jnp.dot(x, r_ref[...], preferred_element_type=f32)           # (C, T)
    h = jnp.dot(tw1_ref[...], fa, preferred_element_type=f32) + tb1_ref[...]
    h = jnp.maximum(h, 0.0)                                            # (O, T)
    fa2 = jnp.dot(tw2_ref[...], h, preferred_element_type=f32) + tb2_ref[...]
    fa2 = 1.0 / (1.0 + jnp.exp(-fa2))                                  # (C, T) sigmoid
    fa_full = jnp.dot(fa2, e_ref[...], preferred_element_type=f32)     # (C, D*T) broadcast over D

    # ---- freq attention TA: causal moving average over T -> conv1x1 -> ReLU -> conv1x1 -> sigmoid ----
    ma = jnp.dot(x, m_ref[...], preferred_element_type=f32)            # (C, D*T)
    g = jnp.dot(fw1_ref[...], ma, preferred_element_type=f32) + fb1_ref[...]
    g = jnp.maximum(g, 0.0)                                            # (O, D*T)
    ta = jnp.dot(fw2_ref[...], g, preferred_element_type=f32) + fb2_ref[...]
    ta = 1.0 / (1.0 + jnp.exp(-ta))                                    # (C, D*T) sigmoid

    # ---- out = x * TA * FA ----
    o_ref[0] = x * ta * fa_full


def ctfa_forward(params, x, *, time_seq):
    """CTFA forward on NCHW-style input x: (B, C, D, T)."""
    B, C, D, T = x.shape
    O = params["tw1"].shape[0]
    W = int(time_seq)
    DT = D * T

    x2 = x.reshape(B, C, DT)                       # lane-dense activation layout

    # Structured operator matrices (static-shape constants; folded at compile time).
    eye_t = jnp.eye(T, dtype=jnp.float32)
    R = jnp.tile(eye_t, (D, 1)) / float(D)         # (D*T, T): mean over D
    E = jnp.tile(eye_t, (1, D))                    # (T, D*T): broadcast over D
    tt = jnp.arange(T)
    diff = tt[None, :] - tt[:, None]               # t - t'
    A = jnp.where((diff >= 0) & (diff < W), 1.0 / W, 0.0).astype(jnp.float32)  # (T, T)
    M = jnp.kron(jnp.eye(D, dtype=jnp.float32), A)  # (D*T, D*T): causal moving avg per d

    const2d = lambda shape: pl.BlockSpec(shape, lambda b: (0, 0))

    out = pl.pallas_call(
        _ctfa_kernel,
        out_shape=jax.ShapeDtypeStruct((B, C, DT), jnp.float32),
        grid=(B,),
        in_specs=[
            pl.BlockSpec((1, C, DT), lambda b: (b, 0, 0)),   # x
            const2d((DT, T)),                                # R
            const2d((T, DT)),                                # E
            const2d((DT, DT)),                               # M
            const2d((O, C)),                                 # time_conv1 weight
            const2d((O, 1)),                                 # time_conv1 bias
            const2d((C, O)),                                 # time_conv2 weight
            const2d((C, 1)),                                 # time_conv2 bias
            const2d((O, C)),                                 # freq_conv1 weight
            const2d((O, 1)),                                 # freq_conv1 bias
            const2d((C, O)),                                 # freq_conv2 weight
            const2d((C, 1)),                                 # freq_conv2 bias
        ],
        out_specs=pl.BlockSpec((1, C, DT), lambda b: (b, 0, 0)),
        compiler_params=pltpu.CompilerParams(
            dimension_semantics=("parallel",)),              # split batch across TCs (v7x)
    )(x2, R, E, M,
      params["tw1"], params["tb1"].reshape(O, 1),
      params["tw2"], params["tb2"].reshape(C, 1),
      params["fw1"], params["fb1"].reshape(O, 1),
      params["fw2"], params["fb2"].reshape(C, 1))

    return out.reshape(B, C, D, T)


# ----------------------------- plain-JAX reference (for correctness check) -----------------------------

def ctfa_reference(params, x, time_seq):
    B, C, D, T = x.shape
    W = int(time_seq)
    # time attention
    fa = jnp.mean(x, axis=2)                                               # (B, C, T)
    h = jnp.einsum("oc,bct->bot", params["tw1"], fa) + params["tb1"][None, :, None]
    h = jnp.maximum(h, 0.0)
    fa2 = jnp.einsum("co,bot->bct", params["tw2"], h) + params["tb2"][None, :, None]
    fa2 = jax.nn.sigmoid(fa2)
    FA = fa2[:, :, None, :]                                                # (B, C, 1, T)
    # freq attention: causal moving average (left zero pad, divide by window size)
    cs = jnp.cumsum(x, axis=-1)
    cs_shift = jnp.pad(cs, ((0, 0), (0, 0), (0, 0), (W, 0)))[..., :T]
    ta = (cs - cs_shift) / W                                               # (B, C, D, T)
    g = jnp.einsum("oc,bcdt->bodt", params["fw1"], ta) + params["fb1"][None, :, None, None]
    g = jnp.maximum(g, 0.0)
    ta2 = jnp.einsum("co,bodt->bcdt", params["fw2"], g) + params["fb2"][None, :, None, None]
    ta2 = jax.nn.sigmoid(ta2)
    return x * ta2 * FA


# ----------------------------- parameters -----------------------------

def init_params(in_ch, out_ch, key):
    ks = jax.random.split(key, 8)
    s = 0.1
    return {
        "tw1": jax.random.normal(ks[0], (out_ch, in_ch), jnp.float32) * s,   # Conv1d(in,out,1)
        "tb1": jax.random.normal(ks[1], (out_ch,), jnp.float32) * s,
        "tw2": jax.random.normal(ks[2], (in_ch, out_ch), jnp.float32) * s,   # Conv1d(out,in,1)
        "tb2": jax.random.normal(ks[3], (in_ch,), jnp.float32) * s,
        "fw1": jax.random.normal(ks[4], (out_ch, in_ch), jnp.float32) * s,   # Conv2d(in,out,1)
        "fb1": jax.random.normal(ks[5], (out_ch,), jnp.float32) * s,
        "fw2": jax.random.normal(ks[6], (in_ch, out_ch), jnp.float32) * s,   # Conv2d(out,in,1)
        "fb2": jax.random.normal(ks[7], (in_ch,), jnp.float32) * s,
    }


# ----------------------------- main -----------------------------

if __name__ == "__main__":
    B, in_ch, out_ch = 2, 4, 16
    D, T, time_seq = 16, 32, 8          # D*T = 512 -> lane-dense (multiple of 128)

    key = jax.random.PRNGKey(0)
    kp, kx = jax.random.split(key)
    params = init_params(in_ch, out_ch, kp)
    x = jax.random.normal(kx, (B, in_ch, D, T), jnp.float32)

    fwd = jax.jit(functools.partial(ctfa_forward, time_seq=time_seq))
    out = jax.block_until_ready(fwd(params, x))

    ref = ctfa_reference(params, x, time_seq)

    assert out.shape == (B, in_ch, D, T), out.shape
    assert bool(jnp.all(jnp.isfinite(out)))
    assert bool(jnp.allclose(out, ref, atol=1e-4, rtol=1e-4))
    print("KERNEL_OK")
</pallas_src>

<mosaic_0001>
module attributes {stable_mosaic.version = 11 : i64} {
  func.func @_ctfa_kernel(%arg0: i32, %arg1: memref<1x4x512xf32, #tpu.memory_space<vmem>>, %arg2: memref<512x32xf32, #tpu.memory_space<vmem>>, %arg3: memref<32x512xf32, #tpu.memory_space<vmem>>, %arg4: memref<512x512xf32, #tpu.memory_space<vmem>>, %arg5: memref<16x4xf32, #tpu.memory_space<vmem>>, %arg6: memref<16x1xf32, #tpu.memory_space<vmem>>, %arg7: memref<4x16xf32, #tpu.memory_space<vmem>>, %arg8: memref<4x1xf32, #tpu.memory_space<vmem>>, %arg9: memref<16x4xf32, #tpu.memory_space<vmem>>, %arg10: memref<16x1xf32, #tpu.memory_space<vmem>>, %arg11: memref<4x16xf32, #tpu.memory_space<vmem>>, %arg12: memref<4x1xf32, #tpu.memory_space<vmem>>, %arg13: memref<1x4x512xf32, #tpu.memory_space<vmem>>) attributes {dimension_semantics = [#tpu.dimension_semantics<parallel>], iteration_bounds = array<i64: 2>, scalar_prefetch = 0 : i64, scratch_operands = 0 : i64, tpu.core_type = #tpu.core_type<tc>, window_params = [{transform_indices = @transform_0, window_bounds = array<i64: 1, 4, 512>}, {pipeline_mode = #tpu.pipeline_mode<synchronous>, transform_indices = @transform_1, window_bounds = array<i64: 512, 32>}, {pipeline_mode = #tpu.pipeline_mode<synchronous>, transform_indices = @transform_2, window_bounds = array<i64: 32, 512>}, {pipeline_mode = #tpu.pipeline_mode<synchronous>, transform_indices = @transform_3, window_bounds = array<i64: 512, 512>}, {pipeline_mode = #tpu.pipeline_mode<synchronous>, transform_indices = @transform_4, window_bounds = array<i64: 16, 4>}, {pipeline_mode = #tpu.pipeline_mode<synchronous>, transform_indices = @transform_5, window_bounds = array<i64: 16, 1>}, {pipeline_mode = #tpu.pipeline_mode<synchronous>, transform_indices = @transform_6, window_bounds = array<i64: 4, 16>}, {pipeline_mode = #tpu.pipeline_mode<synchronous>, transform_indices = @transform_7, window_bounds = array<i64: 4, 1>}, {pipeline_mode = #tpu.pipeline_mode<synchronous>, transform_indices = @transform_8, window_bounds = array<i64: 16, 4>}, {pipeline_mode = #tpu.pipeline_mode<synchronous>, transform_indices = @transform_9, window_bounds = array<i64: 16, 1>}, {pipeline_mode = #tpu.pipeline_mode<synchronous>, transform_indices = @transform_10, window_bounds = array<i64: 4, 16>}, {pipeline_mode = #tpu.pipeline_mode<synchronous>, transform_indices = @transform_11, window_bounds = array<i64: 4, 1>}, {transform_indices = @transform_12, window_bounds = array<i64: 1, 4, 512>}]} {
    %c0 = arith.constant 0 : index
    %c0_0 = arith.constant 0 : index
    %c0_1 = arith.constant 0 : index
    %0 = vector.load %arg1[%c0, %c0_0, %c0_1] : memref<1x4x512xf32, #tpu.memory_space<vmem>>, vector<1x4x512xf32>
    %1 = vector.shape_cast %0 : vector<1x4x512xf32> to vector<4x512xf32>
    %c0_2 = arith.constant 0 : index
    %c0_3 = arith.constant 0 : index
    %2 = vector.load %arg2[%c0_2, %c0_3] : memref<512x32xf32, #tpu.memory_space<vmem>>, vector<512x32xf32>
    %cst = arith.constant dense<0.000000e+00> : vector<4x32xf32>
    %3 = tpu.matmul %1, %2, %cst {dimension_numbers = #tpu.dot_dimension_numbers<[1], [0], [0], [1], [0, 0, 1, 1], [], []>} : vector<4x512xf32>, vector<512x32xf32>, vector<4x32xf32> -> vector<4x32xf32>
    %c0_4 = arith.constant 0 : index
    %c0_5 = arith.constant 0 : index
    %4 = vector.load %arg5[%c0_4, %c0_5] : memref<16x4xf32, #tpu.memory_space<vmem>>, vector<16x4xf32>
    %cst_6 = arith.constant dense<0.000000e+00> : vector<16x32xf32>
    %5 = tpu.matmul %4, %3, %cst_6 {dimension_numbers = #tpu.dot_dimension_numbers<[1], [0], [0], [1], [0, 0, 1, 1], [], []>} : vector<16x4xf32>, vector<4x32xf32>, vector<16x32xf32> -> vector<16x32xf32>
    %c0_7 = arith.constant 0 : index
    %c0_8 = arith.constant 0 : index
    %6 = vector.load %arg6[%c0_7, %c0_8] : memref<16x1xf32, #tpu.memory_space<vmem>>, vector<16x1xf32>
    %7 = vector.broadcast %6 : vector<16x1xf32> to vector<16x32xf32>
    %8 = arith.addf %5, %7 : vector<16x32xf32>
    %cst_9 = arith.constant 0.000000e+00 : f32
    %9 = vector.broadcast %cst_9 : f32 to vector<16x32xf32>
    %10 = arith.maximumf %8, %9 : vector<16x32xf32>
    %c0_10 = arith.constant 0 : index
    %c0_11 = arith.constant 0 : index
    %11 = vector.load %arg7[%c0_10, %c0_11] : memref<4x16xf32, #tpu.memory_space<vmem>>, vector<4x16xf32>
    %cst_12 = arith.constant dense<0.000000e+00> : vector<4x32xf32>
    %12 = tpu.matmul %11, %10, %cst_12 {dimension_numbers = #tpu.dot_dimension_numbers<[1], [0], [0], [1], [0, 0, 1, 1], [], []>} : vector<4x16xf32>, vector<16x32xf32>, vector<4x32xf32> -> vector<4x32xf32>
    %c0_13 = arith.constant 0 : index
    %c0_14 = arith.constant 0 : index
    %13 = vector.load %arg8[%c0_13, %c0_14] : memref<4x1xf32, #tpu.memory_space<vmem>>, vector<4x1xf32>
    %14 = vector.broadcast %13 : vector<4x1xf32> to vector<4x32xf32>
    %15 = arith.addf %12, %14 : vector<4x32xf32>
    %cst_15 = arith.constant 0.000000e+00 : f32
    %16 = vector.broadcast %cst_15 : f32 to vector<4x32xf32>
    %17 = arith.subf %16, %15 : vector<4x32xf32>
    %18 = math.exp %17 : vector<4x32xf32>
    %cst_16 = arith.constant 1.000000e+00 : f32
    %19 = vector.broadcast %cst_16 : f32 to vector<4x32xf32>
    %20 = arith.addf %19, %18 : vector<4x32xf32>
    %cst_17 = arith.constant 1.000000e+00 : f32
    %21 = vector.broadcast %cst_17 : f32 to vector<4x32xf32>
    %22 = arith.divf %21, %20 : vector<4x32xf32>
    %c0_18 = arith.constant 0 : index
    %c0_19 = arith.constant 0 : index
    %23 = vector.load %arg3[%c0_18, %c0_19] : memref<32x512xf32, #tpu.memory_space<vmem>>, vector<32x512xf32>
    %cst_20 = arith.constant dense<0.000000e+00> : vector<4x512xf32>
    %24 = tpu.matmul %22, %23, %cst_20 {dimension_numbers = #tpu.dot_dimension_numbers<[1], [0], [0], [1], [0, 0, 1, 1], [], []>} : vector<4x32xf32>, vector<32x512xf32>, vector<4x512xf32> -> vector<4x512xf32>
    %c0_21 = arith.constant 0 : index
    %c0_22 = arith.constant 0 : index
    %25 = vector.load %arg4[%c0_21, %c0_22] : memref<512x512xf32, #tpu.memory_space<vmem>>, vector<512x512xf32>
    %cst_23 = arith.constant dense<0.000000e+00> : vector<4x512xf32>
    %26 = tpu.matmul %1, %25, %cst_23 {dimension_numbers = #tpu.dot_dimension_numbers<[1], [0], [0], [1], [0, 0, 1, 1], [], []>} : vector<4x512xf32>, vector<512x512xf32>, vector<4x512xf32> -> vector<4x512xf32>
    %c0_24 = arith.constant 0 : index
    %c0_25 = arith.constant 0 : index
    %27 = vector.load %arg9[%c0_24, %c0_25] : memref<16x4xf32, #tpu.memory_space<vmem>>, vector<16x4xf32>
    %cst_26 = arith.constant dense<0.000000e+00> : vector<16x512xf32>
    %28 = tpu.matmul %27, %26, %cst_26 {dimension_numbers = #tpu.dot_dimension_numbers<[1], [0], [0], [1], [0, 0, 1, 1], [], []>} : vector<16x4xf32>, vector<4x512xf32>, vector<16x512xf32> -> vector<16x512xf32>
    %c0_27 = arith.constant 0 : index
    %c0_28 = arith.constant 0 : index
    %29 = vector.load %arg10[%c0_27, %c0_28] : memref<16x1xf32, #tpu.memory_space<vmem>>, vector<16x1xf32>
    %30 = vector.broadcast %29 : vector<16x1xf32> to vector<16x512xf32>
    %31 = arith.addf %28, %30 : vector<16x512xf32>
    %cst_29 = arith.constant 0.000000e+00 : f32
    %32 = vector.broadcast %cst_29 : f32 to vector<16x512xf32>
    %33 = arith.maximumf %31, %32 : vector<16x512xf32>
    %c0_30 = arith.constant 0 : index
    %c0_31 = arith.constant 0 : index
    %34 = vector.load %arg11[%c0_30, %c0_31] : memref<4x16xf32, #tpu.memory_space<vmem>>, vector<4x16xf32>
    %cst_32 = arith.constant dense<0.000000e+00> : vector<4x512xf32>
    %35 = tpu.matmul %34, %33, %cst_32 {dimension_numbers = #tpu.dot_dimension_numbers<[1], [0], [0], [1], [0, 0, 1, 1], [], []>} : vector<4x16xf32>, vector<16x512xf32>, vector<4x512xf32> -> vector<4x512xf32>
    %c0_33 = arith.constant 0 : index
    %c0_34 = arith.constant 0 : index
    %36 = vector.load %arg12[%c0_33, %c0_34] : memref<4x1xf32, #tpu.memory_space<vmem>>, vector<4x1xf32>
    %37 = vector.broadcast %36 : vector<4x1xf32> to vector<4x512xf32>
    %38 = arith.addf %35, %37 : vector<4x512xf32>
    %cst_35 = arith.constant 0.000000e+00 : f32
    %39 = vector.broadcast %cst_35 : f32 to vector<4x512xf32>
    %40 = arith.subf %39, %38 : vector<4x512xf32>
    %41 = math.exp %40 : vector<4x512xf32>
    %cst_36 = arith.constant 1.000000e+00 : f32
    %42 = vector.broadcast %cst_36 : f32 to vector<4x512xf32>
    %43 = arith.addf %42, %41 : vector<4x512xf32>
    %cst_37 = arith.constant 1.000000e+00 : f32
    %44 = vector.broadcast %cst_37 : f32 to vector<4x512xf32>
    %45 = arith.divf %44, %43 : vector<4x512xf32>
    %46 = arith.mulf %1, %45 : vector<4x512xf32>
    %47 = arith.mulf %46, %24 : vector<4x512xf32>
    %c0_38 = arith.constant 0 : index
    %c0_39 = arith.constant 0 : index
    %c0_40 = arith.constant 0 : index
    %48 = vector.load %arg13[%c0_38, %c0_39, %c0_40] : memref<1x4x512xf32, #tpu.memory_space<vmem>>, vector<1x4x512xf32>
    %49 = vector.shape_cast %48 : vector<1x4x512xf32> to vector<4x512xf32>
    %50 = vector.shape_cast %47 : vector<4x512xf32> to vector<1x4x512xf32>
    tpu.vector_store %arg13[%c0_38, %c0_39, %c0_40], %50 {strides = array<i32>} : memref<1x4x512xf32, #tpu.memory_space<vmem>>, vector<1x4x512xf32>,
    return
  }
  func.func @transform_0(%arg0: i32) -> (i32, i32, i32) {
    %c0_i32 = arith.constant 0 : i32
    %c0_i32_0 = arith.constant 0 : i32
    %c0_i32_1 = arith.constant 0 : i32
    return %arg0, %c0_i32, %c0_i32_0 : i32, i32, i32
  }
  func.func @transform_1(%arg0: i32) -> (i32, i32) {
    %c0_i32 = arith.constant 0 : i32
    %c0_i32_0 = arith.constant 0 : i32
    %c0_i32_1 = arith.constant 0 : i32
    return %c0_i32, %c0_i32_0 : i32, i32
  }
  func.func @transform_2(%arg0: i32) -> (i32, i32) {
    %c0_i32 = arith.constant 0 : i32
    %c0_i32_0 = arith.constant 0 : i32
    %c0_i32_1 = arith.constant 0 : i32
    return %c0_i32, %c0_i32_0 : i32, i32
  }
  func.func @transform_3(%arg0: i32) -> (i32, i32) {
    %c0_i32 = arith.constant 0 : i32
    %c0_i32_0 = arith.constant 0 : i32
    %c0_i32_1 = arith.constant 0 : i32
    return %c0_i32, %c0_i32_0 : i32, i32
  }
  func.func @transform_4(%arg0: i32) -> (i32, i32) {
    %c0_i32 = arith.constant 0 : i32
    %c0_i32_0 = arith.constant 0 : i32
    %c0_i32_1 = arith.constant 0 : i32
    return %c0_i32, %c0_i32_0 : i32, i32
  }
  func.func @transform_5(%arg0: i32) -> (i32, i32) {
    %c0_i32 = arith.constant 0 : i32
    %c0_i32_0 = arith.constant 0 : i32
    %c0_i32_1 = arith.constant 0 : i32
    return %c0_i32, %c0_i32_0 : i32, i32
  }
  func.func @transform_6(%arg0: i32) -> (i32, i32) {
    %c0_i32 = arith.constant 0 : i32
    %c0_i32_0 = arith.constant 0 : i32
    %c0_i32_1 = arith.constant 0 : i32
    return %c0_i32, %c0_i32_0 : i32, i32
  }
  func.func @transform_7(%arg0: i32) -> (i32, i32) {
    %c0_i32 = arith.constant 0 : i32
    %c0_i32_0 = arith.constant 0 : i32
    %c0_i32_1 = arith.constant 0 : i32
    return %c0_i32, %c0_i32_0 : i32, i32
  }
  func.func @transform_8(%arg0: i32) -> (i32, i32) {
    %c0_i32 = arith.constant 0 : i32
    %c0_i32_0 = arith.constant 0 : i32
    %c0_i32_1 = arith.constant 0 : i32
    return %c0_i32, %c0_i32_0 : i32, i32
  }
  func.func @transform_9(%arg0: i32) -> (i32, i32) {
    %c0_i32 = arith.constant 0 : i32
    %c0_i32_0 = arith.constant 0 : i32
    %c0_i32_1 = arith.constant 0 : i32
    return %c0_i32, %c0_i32_0 : i32, i32
  }
  func.func @transform_10(%arg0: i32) -> (i32, i32) {
    %c0_i32 = arith.constant 0 : i32
    %c0_i32_0 = arith.constant 0 : i32
    %c0_i32_1 = arith.constant 0 : i32
    return %c0_i32, %c0_i32_0 : i32, i32
  }
  func.func @transform_11(%arg0: i32) -> (i32, i32) {
    %c0_i32 = arith.constant 0 : i32
    %c0_i32_0 = arith.constant 0 : i32
    %c0_i32_1 = arith.constant 0 : i32
    return %c0_i32, %c0_i32_0 : i32, i32
  }
  func.func @transform_12(%arg0: i32) -> (i32, i32, i32) {
    %c0_i32 = arith.constant 0 : i32
    %c0_i32_0 = arith.constant 0 : i32
    %c0_i32_1 = arith.constant 0 : i32
    return %arg0, %c0_i32, %c0_i32_0 : i32, i32, i32
  }
}

</mosaic_0001>

<bundles_post_ra>
// kernel: tile.19
= control target key start
LH: loop header
LB: loop body
LE: loop exit
PB: predicated region body
PF: predicated region fallthrough
CT: control target
= control target key end

     0   :  { %vm118_vm0 = vcmask 1043458   ;;  %s158_s6 = smov 3  ;;  %vm123_vm1 = vcmask 1045508   ;;  %vm128_vm2 = vcmask 1047558   ;;  %s161_s9 = smov 12  ;;  %vm3_vm3 = vcmask 261120   ;;  %s2648_s0 = inlined_call_operand.vmem [shape: f32[32,16,32], index: 0, kind: input, shape index: {}]   ;;  %s2649_s1 = inlined_call_operand.vmem [shape: f32[32,512], index: 1, kind: output, shape index: {}]  }
   0x1   :  { %v1268_v0 = vld [vmem:[%s2648_s0 + $0x103] ss:$16 sm:%s158_s6]   ;;  %s166_s10 = smov 48  ;;  %s171_s15 = smov 192  ;;  %v1223_v54 = vld [vmem:[%s2648_s0 + $0x80] ss:$4 sm:$0xff]  }
   0x2   :  { %v1269_v1 = vld [vmem:[%s2648_s0 + $0x103] ss:$16 sm:%s161_s9]   ;;  %s113_s16 = smov 3  ;;  %s116_s21 = smov 12  ;;  %vm132_vm4 = vcmask 1048320   ;;  %vm499_vm5 = vcmask 785920  }
   0x3   :  { %v1270_v2 = vld [vmem:[%s2648_s0 + $0x103] ss:$16 sm:%s166_s10]   ;;  %v164_v3 = vsel %vm118_vm0, %v1269_v1, %v1268_v0  ;;  %s121_s22 = smov 48  ;;  %s126_s27 = smov 192  ;;  %v1226_v0 = vld [vmem:[%s2648_s0 + $0xa0] ss:$4 sm:$0xff]  }
   0x4   :  { %v1271_v4 = vld [vmem:[%s2648_s0 + $0x103] ss:$16 sm:%s171_s15]   ;;  %v169_v6 = vsel %vm123_vm1, %v1270_v2, %v164_v3  ;;  %s181_s28 = smov 3  ;;  %s184_s4 = smov 12  ;;  %vm866_vm6 = vcmask 523520  }
   0x5   :  { %v1259_v5 = vld [vmem:[%s2648_s0 + $0x3] ss:$16 sm:%s113_s16]   ;;  %v174_v9 = vsel %vm128_vm2, %v1271_v4, %v169_v6  ;;  %s189_s5 = smov 48  ;;  %s1499_s6 = smov 96   ;;  %v1229_v6 = vld [vmem:[%s2648_s0 + $0xc0] ss:$4 sm:$0xff]  }
   0x6   :  { %v1260_v7 = vld [vmem:[%s2648_s0 + $0x3] ss:$16 sm:%s116_s21]   ;;  %175 = vrot.lane.b32.xlu1 %v174_v9, %s1499_s6  ;;  %s194_s9 = smov 192  ;;  %s135_s10 = smov 3 }
   0x7   :  { %v1261_v8 = vld [vmem:[%s2648_s0 + $0x3] ss:$16 sm:%s121_s22]   ;;  %v119_v10 = vsel %vm118_vm0, %v1260_v7, %v1259_v5  ;;  %s138_s15 = smov 12  ;;  %s143_s16 = smov 48 }
   0x8   :  { %v1262_v11 = vld [vmem:[%s2648_s0 + $0x3] ss:$16 sm:%s126_s27]   ;;  %v124_v13 = vsel %vm123_vm1, %v1261_v8, %v119_v10  ;;  %s148_s19 = smov 192  ;;  %s227_s20 = smov 3 }
   0x9   :  { %v1273_v12 = vld [vmem:[%s2648_s0 + $0x183] ss:$16 sm:%s181_s28]   ;;  %v129_v15 = vsel %vm128_vm2, %v1262_v11, %v124_v13  ;;  %s230_s25 = smov 12  ;;  %s235_s26 = smov 48  ;;  %v1283_v27 = vld [vmem:[%s2648_s0 + $0x87] ss:$16 sm:%s227_s20]  }
   0xa   :  { %v1274_v14 = vld [vmem:[%s2648_s0 + $0x183] ss:$16 sm:%s184_s4]   ;;  %130 = vrot.lane.b32.xlu0 %v129_v15, %s1499_s6  ;;  %s240_s29 = smov 192  ;;  %s204_s30 = smov 3 }
   0xb   :  { %v187_v16 = vsel %vm118_vm0, %v1274_v14, %v1273_v12  ;;  %v1275_v17 = vld [vmem:[%s2648_s0 + $0x183] ss:$16 sm:%s189_s5]   ;;  %v1284_v28 = vld [vmem:[%s2648_s0 + $0x87] ss:$16 sm:%s230_s25]   ;;  %s207_s7 = smov 12  ;;  %s212_s8 = smov 48 }
   0xc   :  { %v1276_v18 = vld [vmem:[%s2648_s0 + $0x183] ss:$16 sm:%s194_s9]   ;;  %v192_v19 = vsel %vm123_vm1, %v1275_v17, %v187_v16  ;;  %v233_v30 = vsel %vm118_vm0, %v1284_v28, %v1283_v27  ;;  %v1285_v31 = vld [vmem:[%s2648_s0 + $0x87] ss:$16 sm:%s235_s26]   ;;  %s217_s13 = smov 192  ;;  %s276_s17 = smov 12 }
   0xd   :  { %v1263_v20 = vld [vmem:[%s2648_s0 + $0x83] ss:$16 sm:%s135_s10]   ;;  %v197_v21 = vsel %vm128_vm2, %v1276_v18, %v192_v19  ;;  %v1286_v32 = vld [vmem:[%s2648_s0 + $0x87] ss:$16 sm:%s240_s29]   ;;  %v238_v33 = vsel %vm123_vm1, %v1285_v31, %v233_v30  ;;  %s281_s22 = smov 48  ;;  %s286_s23 = smov 192 }
   0xe   :  { %v1264_v22 = vld [vmem:[%s2648_s0 + $0x83] ss:$16 sm:%s138_s15]   ;;  %198 = vrot.lane.b32.xlu1 %v197_v21, %s1499_s6  ;;  %v243_v35 = vsel %vm128_vm2, %v1286_v32, %v238_v33  ;;  %s250_s26 = smov 3  ;;  %s253_s2 = smov 12  ;;  %v1232_v16 = vld [vmem:[%s2648_s0 + $0xe0] ss:$4 sm:$0xff]  }
   0xf   :  { %v1265_v23 = vld [vmem:[%s2648_s0 + $0x83] ss:$16 sm:%s143_s16]   ;;  %v141_v24 = vsel %vm118_vm0, %v1264_v22, %v1263_v20  ;;  %v1278_v34 = vld [vmem:[%s2648_s0 + $0x7] ss:$16 sm:%s204_s30]   ;;  %s273_s16 = smov 3  ;;  %s258_s3 = smov 48 }
  0x10   :  { %v1266_v25 = vld [vmem:[%s2648_s0 + $0x83] ss:$16 sm:%s148_s19]   ;;  %v146_v26 = vsel %vm123_vm1, %v1265_v23, %v141_v24  ;;  %v1279_v36 = vld [vmem:[%s2648_s0 + $0x7] ss:$16 sm:%s207_s7]   ;;  %s263_s9 = smov 192  ;;  %s319_s12 = smov 3 }
  0x11   :  { %v151_v29 = vsel %vm128_vm2, %v1266_v25, %v146_v26  ;;  %v1280_v37 = vld [vmem:[%s2648_s0 + $0x7] ss:$16 sm:%s212_s8]   ;;  %v210_v38 = vsel %vm118_vm0, %v1279_v36, %v1278_v34  ;;  %s327_s18 = smov 48  ;;  %s332_s19 = smov 192  ;;  %v1303_v56 = vld [vmem:[%s2648_s0 + $0x8b] ss:$16 sm:%s319_s12]  }
  0x12   :  { %152 = vrot.lane.b32.xlu0 %v151_v29, %s1499_s6  ;;  %244 = vrot.lane.b32.xlu1 %v243_v35, %s1499_s6  ;;  %v1281_v39 = vld [vmem:[%s2648_s0 + $0x7] ss:$16 sm:%s217_s13]   ;;  %v215_v40 = vsel %vm123_vm1, %v1280_v37, %v210_v38  ;;  %s322_s13 = smov 12  ;;  %s299_s29 = smov 12 }
  0x13   :  { %v1293_v41 = vld [vmem:[%s2648_s0 + $0x187] ss:$16 sm:%s273_s16]   ;;  %v220_v43 = vsel %vm128_vm2, %v1281_v39, %v215_v40  ;;  %v1304_v57 = vld [vmem:[%s2648_s0 + $0x8b] ss:$16 sm:%s322_s13]   ;;  %s304_s30 = smov 48  ;;  %s309_s11 = smov 192 }
  0x14   :  { %v1294_v42 = vld [vmem:[%s2648_s0 + $0x187] ss:$16 sm:%s276_s17]   ;;  %1224 = vst.msk [vmem:[%s2649_s1 + $0x20] ss:$8 sm:$0xf] %vm3_vm3, %v1223_v54   ;;  %v325_v59 = vsel %vm118_vm0, %v1304_v57, %v1303_v56  ;;  %s365_s14 = smov 3 }
  0x15   :  { %v279_v44 = vsel %vm118_vm0, %v1294_v42, %v1293_v41  ;;  %v1295_v45 = vld [vmem:[%s2648_s0 + $0x187] ss:$16 sm:%s281_s22]   ;;  %s296_s22 = smov 3  ;;  %1225 = vst.msk [vmem:[%s2649_s1 + $0x1] ss:$8 sm:$0xf0] %vm3_vm3, %v1223_v54  }
  0x16   :  { %v1296_v46 = vld [vmem:[%s2648_s0 + $0x187] ss:$16 sm:%s286_s23]   ;;  %221 = vrot.lane.b32.xlu0 %v220_v43, %s1499_s6  ;;  %v284_v47 = vsel %vm123_vm1, %v1295_v45, %v279_v44  ;;  %s368_s15 = smov 12  ;;  %s378_s23 = smov 192  ;;  %v2_v31 = vld [vmem:[%s2648_s0] ss:$4 sm:$0xff]  }
  0x17   :  { %v1288_v48 = vld [vmem:[%s2648_s0 + $0x107] ss:$16 sm:%s250_s26]   ;;  %v289_v49 = vsel %vm128_vm2, %v1296_v46, %v284_v47  ;;  %v1305_v60 = vld [vmem:[%s2648_s0 + $0x8b] ss:$16 sm:%s327_s18]   ;;  %s350_s10 = smov 48  ;;  %s396_s16 = smov 48 }
  0x18   :  { %v1289_v50 = vld [vmem:[%s2648_s0 + $0x107] ss:$16 sm:%s253_s2]   ;;  %290 = vrot.lane.b32.xlu1 %v289_v49, %s1499_s6  ;;  %v330_v62 = vsel %vm123_vm1, %v1305_v60, %v325_v59  ;;  %1227 = vst.msk [vmem:[%s2649_s1 + $0x22] ss:$8 sm:$0xf] %vm3_vm3, %v1226_v0   ;;  %s424_s2 = smov 192 }
  0x19   :  { %v1290_v51 = vld [vmem:[%s2648_s0 + $0x107] ss:$16 sm:%s258_s3]   ;;  %v256_v52 = vsel %vm118_vm0, %v1289_v50, %v1288_v48  ;;  %v1306_v61 = vld [vmem:[%s2648_s0 + $0x8b] ss:$16 sm:%s332_s19]   ;;  %s355_s19 = smov 192  ;;  %s401_s21 = smov 192 }
  0x1a   :  { %v1291_v53 = vld [vmem:[%s2648_s0 + $0x107] ss:$16 sm:%s263_s9]   ;;  %v261_v55 = vsel %vm123_vm1, %v1290_v51, %v256_v52  ;;  %v1298_v63 = vld [vmem:[%s2648_s0 + $0xb] ss:$16 sm:%s296_s22]   ;;  %v335_v1 = vsel %vm128_vm2, %v1306_v61, %v330_v62  ;;  %s373_s22 = smov 48  ;;  %s345_s9 = smov 12 }
  0x1b   :  { %v266_v58 = vsel %vm128_vm2, %v1291_v53, %v261_v55  ;;  %v1299_v2 = vld [vmem:[%s2648_s0 + $0xb] ss:$16 sm:%s299_s29]   ;;  %1228 = vst.msk [vmem:[%s2649_s1 + $0x3] ss:$8 sm:$0xf0] %vm3_vm3, %v1226_v0   ;;  %s457_s24 = smov 3 }
  0x1c   :  { %267 = vrot.lane.b32.xlu0 %v266_v58, %s1499_s6  ;;  %v1300_v3 = vld [vmem:[%s2648_s0 + $0xb] ss:$16 sm:%s304_s30]   ;;  %336 = vrot.lane.b32.xlu1 %v335_v1, %s1499_s6  ;;  %v302_v4 = vsel %vm118_vm0, %v1299_v2, %v1298_v63  ;;  %s342_s30 = smov 3  ;;  %s460_s25 = smov 12 }
  0x1d   :  { %v1301_v5 = vld [vmem:[%s2648_s0 + $0xb] ss:$16 sm:%s309_s11]   ;;  %v307_v7 = vsel %vm123_vm1, %v1300_v3, %v302_v4  ;;  %1230 = vst.msk [vmem:[%s2649_s1 + $0x24] ss:$8 sm:$0xf] %vm3_vm3, %v1229_v6   ;;  %s465_s3 = smov 48 }
  0x1e   :  { %v1313_v8 = vld [vmem:[%s2648_s0 + $0x18b] ss:$16 sm:%s365_s14]   ;;  %1231 = vst.msk [vmem:[%s2649_s1 + $0x5] ss:$8 sm:$0xf0] %vm3_vm3, %v1229_v6   ;;  %v312_v10 = vsel %vm128_vm2, %v1301_v5, %v307_v7  ;;  %s470_s4 = smov 192 }
  0x1f   :  { %v1314_v9 = vld [vmem:[%s2648_s0 + $0x18b] ss:$16 sm:%s368_s15]   ;;  %1233 = vst.msk [vmem:[%s2649_s1 + $0x26] ss:$8 sm:$0xf] %vm3_vm3, %v1232_v16   ;;  %s391_s15 = smov 12 }
  0x20   :  { %v371_v11 = vsel %vm118_vm0, %v1314_v9, %v1313_v8  ;;  %v1315_v12 = vld [vmem:[%s2648_s0 + $0x18b] ss:$16 sm:%s373_s22]   ;;  %313 = vrot.lane.b32.xlu0 %v312_v10, %s1499_s6  ;;  %s411_s22 = smov 3  ;;  %1234 = vst.msk [vmem:[%s2649_s1 + $0x7] ss:$8 sm:$0xf0] %vm3_vm3, %v1232_v16  }
  0x21   :  { %v1316_v13 = vld [vmem:[%s2648_s0 + $0x18b] ss:$16 sm:%s378_s23]   ;;  %v376_v14 = vsel %vm123_vm1, %v1315_v12, %v371_v11  ;;  %s414_s23 = smov 12  ;;  %v1323_v23 = vld [vmem:[%s2648_s0 + $0x8f] ss:$16 sm:%s411_s22]   ;;  %s434_s12 = smov 3 }
  0x22   :  { %v1308_v15 = vld [vmem:[%s2648_s0 + $0x10b] ss:$16 sm:%s342_s30]   ;;  %v381_v17 = vsel %vm128_vm2, %v1316_v13, %v376_v14  ;;  %s419_s30 = smov 48  ;;  %v1324_v24 = vld [vmem:[%s2648_s0 + $0x8f] ss:$16 sm:%s414_s23]   ;;  %s442_s20 = smov 48 }
  0x23   :  { %v1309_v18 = vld [vmem:[%s2648_s0 + $0x10b] ss:$16 sm:%s345_s9]   ;;  %382 = vrot.lane.b32.xlu1 %v381_v17, %s1499_s6  ;;  %v417_v26 = vsel %vm118_vm0, %v1324_v24, %v1323_v23  ;;  %4 = vst.msk [vmem:[%s2649_s1] ss:$8 sm:$0xf] %vm3_vm3, %v2_v31   ;;  %s447_s29 = smov 192 }
  0x24   :  { %v1310_v19 = vld [vmem:[%s2648_s0 + $0x10b] ss:$16 sm:%s350_s10]   ;;  %v348_v20 = vsel %vm118_vm0, %v1309_v18, %v1308_v15  ;;  %s388_s10 = smov 3  ;;  %v1325_v27 = vld [vmem:[%s2648_s0 + $0x8f] ss:$16 sm:%s419_s30]   ;;  %s515_s13 = smov 192 }
  0x25   :  { %v1311_v21 = vld [vmem:[%s2648_s0 + $0x10b] ss:$16 sm:%s355_s19]   ;;  %v353_v22 = vsel %vm123_vm1, %v1310_v19, %v348_v20  ;;  %v1326_v28 = vld [vmem:[%s2648_s0 + $0x8f] ss:$16 sm:%s424_s2]   ;;  %v422_v29 = vsel %vm123_vm1, %v1325_v27, %v417_v26  ;;  %s437_s19 = smov 12  ;;  %s483_s27 = smov 12 }
  0x26   :  { %v358_v25 = vsel %vm128_vm2, %v1311_v21, %v353_v22  ;;  %v1318_v30 = vld [vmem:[%s2648_s0 + $0xf] ss:$16 sm:%s388_s10]   ;;  %v427_v32 = vsel %vm128_vm2, %v1326_v28, %v422_v29  ;;  %1213 = vst.msk [vmem:[%s2649_s1 - $0x1f] ss:$8 sm:$0xf0] %vm3_vm3, %v2_v31   ;;  %s488_s28 = smov 48 }
  0x27   :  { %359 = vrot.lane.b32.xlu0 %v358_v25, %s1499_s6  ;;  %v1319_v33 = vld [vmem:[%s2648_s0 + $0xf] ss:$16 sm:%s391_s15]   ;;  %428 = vrot.lane.b32.xlu1 %v427_v32, %s1499_s6  ;;  %s493_s9 = smov 192  ;;  %s548_s11 = smov 3 }
  0x28   :  { %v1320_v34 = vld [vmem:[%s2648_s0 + $0xf] ss:$16 sm:%s396_s16]   ;;  %v394_v35 = vsel %vm118_vm0, %v1319_v33, %v1318_v30  ;;  %v1214_v37 = vld [vmem:[%s2648_s0 + $0x20] ss:$4 sm:$0xff]   ;;  %s528_s7 = smov 12  ;;  %s533_s8 = smov 48 }
  0x29   :  { %v1321_v36 = vld [vmem:[%s2648_s0 + $0xf] ss:$16 sm:%s401_s21]   ;;  %v399_v38 = vsel %vm123_vm1, %v1320_v34, %v394_v35  ;;  %1215 = vst.msk [vmem:[%s2649_s1 + $0x2] ss:$8 sm:$0xf] %vm3_vm3, %v1214_v37   ;;  %s538_s16 = smov 192 }
  0x2a   :  { %v1333_v39 = vld [vmem:[%s2648_s0 + $0x18f] ss:$16 sm:%s457_s24]   ;;  %1216 = vst.msk [vmem:[%s2649_s1 - $0x1d] ss:$8 sm:$0xf0] %vm3_vm3, %v1214_v37   ;;  %v404_v41 = vsel %vm128_vm2, %v1321_v36, %v399_v38  ;;  %s574_s14 = smov 12 }
  0x2b   :  { %v1334_v40 = vld [vmem:[%s2648_s0 + $0x18f] ss:$16 sm:%s460_s25]   ;;  %405 = vrot.lane.b32.xlu0 %v404_v41, %s1499_s6  ;;  %v1217_v47 = vld [vmem:[%s2648_s0 + $0x40] ss:$4 sm:$0xff]   ;;  %s1500_s25 = smov 64   ;;  %s579_s15 = smov 48 }
  0x2c   :  { %v463_v42 = vsel %vm118_vm0, %v1334_v40, %v1333_v39  ;;  %v1335_v43 = vld [vmem:[%s2648_s0 + $0x18f] ss:$16 sm:%s465_s3]   ;;  %s502_s3 = smov 3  ;;  %1218 = vst.msk [vmem:[%s2649_s1 + $0x4] ss:$8 sm:$0xf] %vm3_vm3, %v1217_v47  }
  0x2d   :  { %v1336_v44 = vld [vmem:[%s2648_s0 + $0x18f] ss:$16 sm:%s470_s4]   ;;  %v468_v45 = vsel %vm123_vm1, %v1335_v43, %v463_v42  ;;  %s505_s4 = smov 12  ;;  %1219 = vst.msk [vmem:[%s2649_s1 - $0x1b] ss:$8 sm:$0xf0] %vm3_vm3, %v1217_v47  }
  0x2e   :  { %v1328_v46 = vld [vmem:[%s2648_s0 + $0x10f] ss:$16 sm:%s434_s12]   ;;  %v473_v48 = vsel %vm128_vm2, %v1336_v44, %v468_v45  ;;  %s510_s12 = smov 48  ;;  %v1220_v53 = vld [vmem:[%s2648_s0 + $0x60] ss:$4 sm:$0xff]   ;;  %s584_s24 = smov 192 }
  0x2f   :  { %v1329_v49 = vld [vmem:[%s2648_s0 + $0x10f] ss:$16 sm:%s437_s19]   ;;  %474 = vrot.lane.b32.xlu1 %v473_v48, %s1499_s6  ;;  %1221 = vst.msk [vmem:[%s2649_s1 + $0x6] ss:$8 sm:$0xf] %vm3_vm3, %v1220_v53   ;;  %s556_s19 = smov 48 }
  0x30   :  { %v1330_v50 = vld [vmem:[%s2648_s0 + $0x10f] ss:$16 sm:%s442_s20]   ;;  %v440_v51 = vsel %vm118_vm0, %v1329_v49, %v1328_v46  ;;  %s480_s20 = smov 3  ;;  %v1342_v55 = vld [vmem:[%s2648_s0 + $0x82] ss:$16 sm:%s502_s3]   ;;  %s620_s22 = smov 12 }
  0x31   :  { %v1331_v52 = vld [vmem:[%s2648_s0 + $0x10f] ss:$16 sm:%s447_s29]   ;;  %v445_v54 = vsel %vm123_vm1, %v1330_v50, %v440_v51  ;;  %v1343_v56 = vld [vmem:[%s2648_s0 + $0x82] ss:$16 sm:%s505_s4]   ;;  %s607_s29 = smov 192  ;;  %s625_s23 = smov 48 }
  0x32   :  { %1222 = vst.msk [vmem:[%s2649_s1 - $0x19] ss:$8 sm:$0xf0] %vm3_vm3, %v1220_v53   ;;  %v450_v57 = vsel %vm128_vm2, %v1331_v52, %v445_v54  ;;  %v508_v58 = vsel %vm118_vm0, %v1343_v56, %v1342_v55  ;;  %v1344_v59 = vld [vmem:[%s2648_s0 + $0x82] ss:$16 sm:%s510_s12]   ;;  %s551_s12 = smov 12 }
  0x33   :  { %v1345_v60 = vld [vmem:[%s2648_s0 + $0x82] ss:$16 sm:%s515_s13]   ;;  %451 = vrot.lane.b32.xlu0 %v450_v57, %s1499_s6  ;;  %v513_v61 = vsel %vm123_vm1, %v1344_v59, %v508_v58  ;;  %v1247_v63 = vld [vmem:[%s2648_s0 + $0x180] ss:$4 sm:$0xff]   ;;  %s630_s4 = smov 192  ;;  %s666_s2 = smov 12 }
  0x34   :  { %v1338_v62 = vld [vmem:[%s2648_s0 + $0x2] ss:$16 sm:%s480_s20]   ;;  %v518_v0 = vsel %vm128_vm2, %v1345_v60, %v513_v61  ;;  %s561_s20 = smov 192  ;;  %1248 = vst.msk [vmem:[%s2649_s1 + $0x60] ss:$8 sm:$0xf] %vm3_vm3, %v1247_v63  }
  0x35   :  { %v1339_v1 = vld [vmem:[%s2648_s0 + $0x2] ss:$16 sm:%s483_s27]   ;;  %1249 = vst.msk [vmem:[%s2649_s1 + $0x41] ss:$8 sm:$0xf0] %vm3_vm3, %v1247_v63   ;;  %519 = vrot.lane.b32.xlu1 %v518_v0, %s1500_s25  ;;  %s671_s3 = smov 48 }
  0x36   :  { %v1340_v2 = vld [vmem:[%s2648_s0 + $0x2] ss:$16 sm:%s488_s28]   ;;  %v486_v3 = vsel %vm118_vm0, %v1339_v1, %v1338_v62  ;;  %s525_s28 = smov 3  ;;  %v1250_v5 = vld [vmem:[%s2648_s0 + $0x1a0] ss:$4 sm:$0xff]   ;;  %s740_s21 = smov 48 }
  0x37   :  { %v1341_v4 = vld [vmem:[%s2648_s0 + $0x2] ss:$16 sm:%s493_s9]   ;;  %v491_v6 = vsel %vm123_vm1, %v1340_v2, %v486_v3  ;;  %1251 = vst.msk [vmem:[%s2649_s1 + $0x62] ss:$8 sm:$0xf] %vm3_vm3, %v1250_v5   ;;  %s653_s9 = smov 192 }
  0x38   :  { %v1352_v7 = vld [vmem:[%s2648_s0 + $0x182] ss:$16 sm:%s548_s11]   ;;  %1252 = vst.msk [vmem:[%s2649_s1 + $0x43] ss:$8 sm:$0xf0] %vm3_vm3, %v1250_v5   ;;  %v496_v9 = vsel %vm128_vm2, %v1341_v4, %v491_v6  ;;  %s709_s26 = smov 3 }
  0x39   :  { %v1353_v8 = vld [vmem:[%s2648_s0 + $0x182] ss:$16 sm:%s551_s12]   ;;  %497 = vrot.lane.b32.xlu0 %v496_v9, %s1500_s25  ;;  %v1253_v15 = vld [vmem:[%s2648_s0 + $0x1c0] ss:$4 sm:$0xff]   ;;  %s676_s12 = smov 192  ;;  %s778_s11 = smov 3 }
  0x3a   :  { %v554_v10 = vsel %vm118_vm0, %v1353_v8, %v1352_v7  ;;  %v1354_v11 = vld [vmem:[%s2648_s0 + $0x182] ss:$16 sm:%s556_s19]   ;;  %s594_s19 = smov 3  ;;  %1254 = vst.msk [vmem:[%s2649_s1 + $0x64] ss:$8 sm:$0xf] %vm3_vm3, %v1253_v15  }
  0x3b   :  { %v1355_v12 = vld [vmem:[%s2648_s0 + $0x182] ss:$16 sm:%s561_s20]   ;;  %v559_v13 = vsel %vm123_vm1, %v1354_v11, %v554_v10  ;;  %s597_s20 = smov 12  ;;  %1255 = vst.msk [vmem:[%s2649_s1 + $0x45] ss:$8 sm:$0xf0] %vm3_vm3, %v1253_v15  }
  0x3c   :  { %v1347_v14 = vld [vmem:[%s2648_s0 + $0x102] ss:$16 sm:%s525_s28]   ;;  %v564_v16 = vsel %vm128_vm2, %v1355_v12, %v559_v13  ;;  %s602_s28 = smov 48  ;;  %v1256_v21 = vld [vmem:[%s2648_s0 + $0x1e0] ss:$4 sm:$0xff]   ;;  %s786_s17 = smov 48 }
  0x3d   :  { %v1348_v17 = vld [vmem:[%s2648_s0 + $0x102] ss:$16 sm:%s528_s7]   ;;  %565 = vrot.lane.b32.xlu1 %v564_v16, %s1500_s25  ;;  %1257 = vst.msk [vmem:[%s2649_s1 + $0x66] ss:$8 sm:$0xf] %vm3_vm3, %v1256_v21   ;;  %s791_s18 = smov 192 }
  0x3e   :  { %v1349_v18 = vld [vmem:[%s2648_s0 + $0x102] ss:$16 sm:%s533_s8]   ;;  %v531_v19 = vsel %vm118_vm0, %v1348_v17, %v1347_v14  ;;  %s571_s8 = smov 3  ;;  %v1362_v23 = vld [vmem:[%s2648_s0 + $0x86] ss:$16 sm:%s594_s19]   ;;  %s758_s27 = smov 12 }
  0x3f   :  { %v1350_v20 = vld [vmem:[%s2648_s0 + $0x102] ss:$16 sm:%s538_s16]   ;;  %v536_v22 = vsel %vm123_vm1, %v1349_v18, %v531_v19  ;;  %v1363_v24 = vld [vmem:[%s2648_s0 + $0x86] ss:$16 sm:%s597_s20]   ;;  %s699_s16 = smov 192  ;;  %s832_s13 = smov 48 }
  0x40   :  { %1258 = vst.msk [vmem:[%s2649_s1 + $0x47] ss:$8 sm:$0xf0] %vm3_vm3, %v1256_v21   ;;  %v541_v25 = vsel %vm128_vm2, %v1350_v20, %v536_v22  ;;  %v600_v26 = vsel %vm118_vm0, %v1363_v24, %v1362_v23  ;;  %v1364_v27 = vld [vmem:[%s2648_s0 + $0x86] ss:$16 sm:%s602_s28]   ;;  %s640_s28 = smov 3 }
  0x41   :  { %v1365_v28 = vld [vmem:[%s2648_s0 + $0x86] ss:$16 sm:%s607_s29]   ;;  %542 = vrot.lane.b32.xlu0 %v541_v25, %s1500_s25  ;;  %v605_v29 = vsel %vm123_vm1, %v1364_v27, %v600_v26  ;;  %s643_s29 = smov 12  ;;  %v1235_v31 = vld [vmem:[%s2648_s0 + $0x100] ss:$4 sm:$0xff]   ;;  %s877_s6 = smov 48 }
  0x42   :  { %v1357_v30 = vld [vmem:[%s2648_s0 + $0x6] ss:$16 sm:%s571_s8]   ;;  %v610_v32 = vsel %vm128_vm2, %v1365_v28, %v605_v29  ;;  %s648_s8 = smov 48  ;;  %1236 = vst.msk [vmem:[%s2649_s1 + $0x40] ss:$8 sm:$0xf] %vm3_vm3, %v1235_v31  }
  0x43   :  { %v1358_v33 = vld [vmem:[%s2648_s0 + $0x6] ss:$16 sm:%s574_s14]   ;;  %1237 = vst.msk [vmem:[%s2649_s1 + $0x21] ss:$8 sm:$0xf0] %vm3_vm3, %v1235_v31   ;;  %611 = vrot.lane.b32.xlu1 %v610_v32, %s1500_s25  ;;  %s837_s14 = smov 192 }
  0x44   :  { %v1359_v34 = vld [vmem:[%s2648_s0 + $0x6] ss:$16 sm:%s579_s15]   ;;  %v577_v35 = vsel %vm118_vm0, %v1358_v33, %v1357_v30  ;;  %s617_s15 = smov 3  ;;  %v1238_v37 = vld [vmem:[%s2648_s0 + $0x120] ss:$4 sm:$0xff]   ;;  %s882_s10 = smov 192 }
  0x45   :  { %v1360_v36 = vld [vmem:[%s2648_s0 + $0x6] ss:$16 sm:%s584_s24]   ;;  %v582_v38 = vsel %vm123_vm1, %v1359_v34, %v577_v35  ;;  %1239 = vst.msk [vmem:[%s2649_s1 + $0x42] ss:$8 sm:$0xf] %vm3_vm3, %v1238_v37   ;;  %s855_s19 = smov 48 }
  0x46   :  { %v1372_v39 = vld [vmem:[%s2648_s0 + $0x186] ss:$16 sm:%s640_s28]   ;;  %1240 = vst.msk [vmem:[%s2649_s1 + $0x23] ss:$8 sm:$0xf0] %vm3_vm3, %v1238_v37   ;;  %v587_v41 = vsel %vm128_vm2, %v1360_v36, %v582_v38  ;;  %s763_s28 = smov 48 }
  0x47   :  { %v1373_v40 = vld [vmem:[%s2648_s0 + $0x186] ss:$16 sm:%s643_s29]   ;;  %588 = vrot.lane.b32.xlu0 %v587_v41, %s1500_s25  ;;  %v1241_v47 = vld [vmem:[%s2648_s0 + $0x140] ss:$4 sm:$0xff]   ;;  %s814_s29 = smov 192  ;;  %s860_s24 = smov 192 }
  0x48   :  { %v646_v42 = vsel %vm118_vm0, %v1373_v40, %v1372_v39  ;;  %v1374_v43 = vld [vmem:[%s2648_s0 + $0x186] ss:$16 sm:%s648_s8]   ;;  %s686_s8 = smov 3  ;;  %1242 = vst.msk [vmem:[%s2649_s1 + $0x44] ss:$8 sm:$0xf] %vm3_vm3, %v1241_v47  }
  0x49   :  { %v1375_v44 = vld [vmem:[%s2648_s0 + $0x186] ss:$16 sm:%s653_s9]   ;;  %v651_v45 = vsel %vm123_vm1, %v1374_v43, %v646_v42  ;;  %s689_s9 = smov 12  ;;  %1243 = vst.msk [vmem:[%s2649_s1 + $0x25] ss:$8 sm:$0xf0] %vm3_vm3, %v1241_v47  }
  0x4a   :  { %v1367_v46 = vld [vmem:[%s2648_s0 + $0x106] ss:$16 sm:%s617_s15]   ;;  %v656_v48 = vsel %vm128_vm2, %v1375_v44, %v651_v45  ;;  %s694_s15 = smov 48  ;;  %v1244_v53 = vld [vmem:[%s2648_s0 + $0x160] ss:$4 sm:$0xff]   ;;  %s928_s5 = smov 192 }
  0x4b   :  { %v1368_v49 = vld [vmem:[%s2648_s0 + $0x106] ss:$16 sm:%s620_s22]   ;;  %657 = vrot.lane.b32.xlu1 %v656_v48, %s1500_s25  ;;  %1245 = vst.msk [vmem:[%s2649_s1 + $0x46] ss:$8 sm:$0xf] %vm3_vm3, %v1244_v53   ;;  %s745_s22 = smov 192 }
  0x4c   :  { %v1369_v50 = vld [vmem:[%s2648_s0 + $0x106] ss:$16 sm:%s625_s23]   ;;  %v623_v51 = vsel %vm118_vm0, %v1368_v49, %v1367_v46  ;;  %s663_s23 = smov 3  ;;  %v1382_v55 = vld [vmem:[%s2648_s0 + $0x8a] ss:$16 sm:%s686_s8]   ;;  %s824_s8 = smov 3 }
  0x4d   :  { %v1370_v52 = vld [vmem:[%s2648_s0 + $0x106] ss:$16 sm:%s630_s4]   ;;  %v628_v54 = vsel %vm123_vm1, %v1369_v50, %v623_v51  ;;  %v1383_v56 = vld [vmem:[%s2648_s0 + $0x8a] ss:$16 sm:%s689_s9]   ;;  %s722_s9 = smov 192  ;;  %s768_s4 = smov 192 }
  0x4e   :  { %1246 = vst.msk [vmem:[%s2649_s1 + $0x27] ss:$8 sm:$0xf0] %vm3_vm3, %v1244_v53   ;;  %v633_v57 = vsel %vm128_vm2, %v1370_v52, %v628_v54  ;;  %v692_v58 = vsel %vm118_vm0, %v1383_v56, %v1382_v55  ;;  %v1384_v59 = vld [vmem:[%s2648_s0 + $0x8a] ss:$16 sm:%s694_s15]   ;;  %s732_s15 = smov 3 }
  0x4f   :  { %v1385_v60 = vld [vmem:[%s2648_s0 + $0x8a] ss:$16 sm:%s699_s16]   ;;  %634 = vrot.lane.b32.xlu0 %v633_v57, %s1500_s25  ;;  %v697_v61 = vsel %vm123_vm1, %v1384_v59, %v692_v58  ;;  %s735_s16 = smov 12  ;;  %s1501_s7 = smov 32  }
  0x50   :  { %v1377_v62 = vld [vmem:[%s2648_s0 + $0xa] ss:$16 sm:%s663_s23]   ;;  %v702_v63 = vsel %vm128_vm2, %v1385_v60, %v697_v61  ;;  %v1402_v19 = vld [vmem:[%s2648_s0 + $0x8e] ss:$16 sm:%s778_s11]   ;;  %s809_s23 = smov 48  ;;  %s905_s20 = smov 192 }
  0x51   :  { %v1378_v0 = vld [vmem:[%s2648_s0 + $0xa] ss:$16 sm:%s666_s2]   ;;  %703 = vrot.lane.b32.xlu1 %v702_v63, %s1500_s25  ;;  %s712_s2 = smov 12  ;;  %s974_s30 = smov 192 }
  0x52   :  { %v1379_v1 = vld [vmem:[%s2648_s0 + $0xa] ss:$16 sm:%s671_s3]   ;;  %v669_v2 = vsel %vm118_vm0, %v1378_v0, %v1377_v62  ;;  %s717_s3 = smov 48  ;;  %v1404_v23 = vld [vmem:[%s2648_s0 + $0x8e] ss:$16 sm:%s786_s17]   ;;  %s801_s17 = smov 3 }
  0x53   :  { %v1380_v3 = vld [vmem:[%s2648_s0 + $0xa] ss:$16 sm:%s676_s12]   ;;  %v674_v4 = vsel %vm123_vm1, %v1379_v1, %v669_v2  ;;  %s781_s12 = smov 12  ;;  %v1405_v24 = vld [vmem:[%s2648_s0 + $0x8e] ss:$16 sm:%s791_s18]   ;;  %s850_s18 = smov 12 }
  0x54   :  { %v1392_v5 = vld [vmem:[%s2648_s0 + $0x18a] ss:$16 sm:%s732_s15]   ;;  %v679_v7 = vsel %vm128_vm2, %v1380_v3, %v674_v4  ;;  %v1403_v20 = vld [vmem:[%s2648_s0 + $0x8e] ss:$16 sm:%s781_s12]   ;;  %s900_s15 = smov 48  ;;  %s946_s11 = smov 48 }
  0x55   :  { %v1393_v6 = vld [vmem:[%s2648_s0 + $0x18a] ss:$16 sm:%s735_s16]   ;;  %680 = vrot.lane.b32.xlu0 %v679_v7, %s1500_s25  ;;  %v784_v22 = vsel %vm118_vm0, %v1403_v20, %v1402_v19  ;;  %s951_s16 = smov 192  ;;  %s997_s12 = smov 192 }
  0x56   :  { %v738_v8 = vsel %vm118_vm0, %v1393_v6, %v1392_v5  ;;  %v1394_v9 = vld [vmem:[%s2648_s0 + $0x18a] ss:$16 sm:%s740_s21]   ;;  %s755_s21 = smov 3  ;;  %v789_v25 = vsel %vm123_vm1, %v1404_v23, %v784_v22  ;;  %v1398_v28 = vld [vmem:[%s2648_s0 + $0xe] ss:$16 sm:%s758_s27]   ;;  %s915_s27 = smov 3 }
  0x57   :  { %v1395_v10 = vld [vmem:[%s2648_s0 + $0x18a] ss:$16 sm:%s745_s22]   ;;  %v743_v11 = vsel %vm123_vm1, %v1394_v9, %v738_v8  ;;  %v1397_v26 = vld [vmem:[%s2648_s0 + $0xe] ss:$16 sm:%s755_s21]   ;;  %v794_v27 = vsel %vm128_vm2, %v1405_v24, %v789_v25  ;;  %s804_s22 = smov 12  ;;  %s1061_s21 = smov 48 }
  0x58   :  { %v1387_v12 = vld [vmem:[%s2648_s0 + $0x10a] ss:$16 sm:%s709_s26]   ;;  %v748_v13 = vsel %vm128_vm2, %v1395_v10, %v743_v11  ;;  %v1399_v29 = vld [vmem:[%s2648_s0 + $0xe] ss:$16 sm:%s763_s28]   ;;  %v761_v30 = vsel %vm118_vm0, %v1398_v28, %v1397_v26  ;;  %s918_s28 = smov 12  ;;  %s1020_s26 = smov 192 }
  0x59   :  { %v1388_v14 = vld [vmem:[%s2648_s0 + $0x10a] ss:$16 sm:%s712_s2]   ;;  %749 = vrot.lane.b32.xlu1 %v748_v13, %s1500_s25  ;;  %v766_v32 = vsel %vm123_vm1, %v1399_v29, %v761_v30  ;;  %s1038_s2 = smov 48 }
  0x5a   :  { %v1389_v15 = vld [vmem:[%s2648_s0 + $0x10a] ss:$16 sm:%s717_s3]   ;;  %v715_v16 = vsel %vm118_vm0, %v1388_v14, %v1387_v12  ;;  %v1400_v31 = vld [vmem:[%s2648_s0 + $0xe] ss:$16 sm:%s768_s4]   ;;  %s869_s3 = smov 3  ;;  %s872_s4 = smov 12 }
  0x5b   :  { %v1390_v17 = vld [vmem:[%s2648_s0 + $0x10a] ss:$16 sm:%s722_s9]   ;;  %v720_v18 = vsel %vm123_vm1, %v1389_v15, %v715_v16  ;;  %s827_s9 = smov 12  ;;  %v1412_v33 = vld [vmem:[%s2648_s0 + $0x18e] ss:$16 sm:%s824_s8]   ;;  %v771_v35 = vsel %vm128_vm2, %v1400_v31, %v766_v32  ;;  %s992_s8 = smov 48 }
  0x5c   :  { %v725_v21 = vsel %vm128_vm2, %v1390_v17, %v720_v18  ;;  %v1413_v34 = vld [vmem:[%s2648_s0 + $0x18e] ss:$16 sm:%s827_s9]   ;;  %v1421_v47 = vld [vmem:[%s2648_s0 + $0x81] ss:$16 sm:%s869_s3]   ;;  %s1043_s9 = smov 192  ;;  %s1089_s3 = smov 192 }
  0x5d   :  { %726 = vrot.lane.b32.xlu0 %v725_v21, %s1500_s25  ;;  %795 = vrot.lane.b32.xlu1 %v794_v27, %s1500_s25  ;;  %v830_v36 = vsel %vm118_vm0, %v1413_v34, %v1412_v33  ;;  %v1414_v37 = vld [vmem:[%s2648_s0 + $0x18e] ss:$16 sm:%s832_s13]   ;;  %s847_s13 = smov 3 }
  0x5e   :  { %v1415_v38 = vld [vmem:[%s2648_s0 + $0x18e] ss:$16 sm:%s837_s14]   ;;  %v835_v39 = vsel %vm123_vm1, %v1414_v37, %v830_v36  ;;  %v1422_v48 = vld [vmem:[%s2648_s0 + $0x81] ss:$16 sm:%s872_s4]   ;;  %s923_s4 = smov 48  ;;  %s895_s14 = smov 12 }
  0x5f   :  { %v1407_v40 = vld [vmem:[%s2648_s0 + $0x10e] ss:$16 sm:%s801_s17]   ;;  %v840_v41 = vsel %vm128_vm2, %v1415_v38, %v835_v39  ;;  %v875_v50 = vsel %vm118_vm0, %v1422_v48, %v1421_v47  ;;  %v1423_v51 = vld [vmem:[%s2648_s0 + $0x81] ss:$16 sm:%s877_s6]   ;;  %s892_s6 = smov 3  ;;  %s1107_s17 = smov 48 }
  0x60   :  { %v1408_v42 = vld [vmem:[%s2648_s0 + $0x10e] ss:$16 sm:%s804_s22]   ;;  %v1424_v52 = vld [vmem:[%s2648_s0 + $0x81] ss:$16 sm:%s882_s10]   ;;  %v880_v53 = vsel %vm123_vm1, %v1423_v51, %v875_v50  ;;  %s941_s10 = smov 12  ;;  %s1066_s22 = smov 192 }
  0x61   :  { %772 = vrot.lane.b32.xlu0 %v771_v35, %s1500_s25  ;;  %v1409_v43 = vld [vmem:[%s2648_s0 + $0x10e] ss:$16 sm:%s809_s23]   ;;  %841 = vrot.lane.b32.xlu1 %v840_v41, %s1500_s25  ;;  %v807_v44 = vsel %vm118_vm0, %v1408_v42, %v1407_v40  ;;  %v885_v55 = vsel %vm128_vm2, %v1424_v52, %v880_v53  ;;  %s961_s23 = smov 3 }
  0x62   :  { %v1410_v45 = vld [vmem:[%s2648_s0 + $0x10e] ss:$16 sm:%s814_s29]   ;;  %v812_v46 = vsel %vm123_vm1, %v1409_v43, %v807_v44  ;;  %v1417_v54 = vld [vmem:[%s2648_s0 + $0x1] ss:$16 sm:%s847_s13]   ;;  %s969_s29 = smov 48  ;;  %s1153_s13 = smov 48 }
  0x63   :  { %v817_v49 = vsel %vm128_vm2, %v1410_v45, %v812_v46  ;;  %v1418_v56 = vld [vmem:[%s2648_s0 + $0x1] ss:$16 sm:%s850_s18]   ;;  %v1441_v11 = vld [vmem:[%s2648_s0 + $0x85] ss:$16 sm:%s961_s23]   ;;  %s1112_s18 = smov 192  ;;  %s1130_s23 = smov 48 }
  0x64   :  { %v1419_v57 = vld [vmem:[%s2648_s0 + $0x1] ss:$16 sm:%s855_s19]   ;;  %v853_v58 = vsel %vm118_vm0, %v1418_v56, %v1417_v54  ;;  %v1443_v15 = vld [vmem:[%s2648_s0 + $0x85] ss:$16 sm:%s969_s29]   ;;  %s1007_s19 = smov 3  ;;  %s984_s29 = smov 3 }
  0x65   :  { %818 = vrot.lane.b32.xlu0 %v817_v49, %s1500_s25  ;;  %886 = vrot.lane.b32.xlu1 %v885_v55, %s1501_s7  ;;  %v1420_v59 = vld [vmem:[%s2648_s0 + $0x1] ss:$16 sm:%s860_s24]   ;;  %v858_v60 = vsel %vm123_vm1, %v1419_v57, %v853_v58  ;;  %s964_s24 = smov 12  ;;  %s1015_s25 = smov 48 }
  0x66   :  { %v1431_v61 = vld [vmem:[%s2648_s0 + $0x181] ss:$16 sm:%s915_s27]   ;;  %v863_v63 = vsel %vm128_vm2, %v1420_v59, %v858_v60  ;;  %v1442_v12 = vld [vmem:[%s2648_s0 + $0x85] ss:$16 sm:%s964_s24]   ;;  %s1084_s27 = smov 48  ;;  %s1181_s24 = smov 192 }
  0x67   :  { %v1432_v62 = vld [vmem:[%s2648_s0 + $0x181] ss:$16 sm:%s918_s28]   ;;  %v967_v14 = vsel %vm118_vm0, %v1442_v12, %v1441_v11  ;;  %v1444_v16 = vld [vmem:[%s2648_s0 + $0x85] ss:$16 sm:%s974_s30]   ;;  %s1033_s30 = smov 12  ;;  %s1135_s28 = smov 192 }
  0x68   :  { %v921_v0 = vsel %vm118_vm0, %v1432_v62, %v1431_v61  ;;  %v1433_v1 = vld [vmem:[%s2648_s0 + $0x181] ss:$16 sm:%s923_s4]   ;;  %s938_s4 = smov 3  ;;  %v972_v17 = vsel %vm123_vm1, %v1443_v15, %v967_v14  ;;  %v1437_v20 = vld [vmem:[%s2648_s0 + $0x5] ss:$16 sm:%s941_s10]   ;;  %s1204_s10 = smov 192 }
  0x69   :  { %v1434_v2 = vld [vmem:[%s2648_s0 + $0x181] ss:$16 sm:%s928_s5]   ;;  %864 = vrot.lane.b32.xlu0 %v863_v63, %s1501_s7  ;;  %v926_v3 = vsel %vm123_vm1, %v1433_v1, %v921_v0  ;;  %v977_v19 = vsel %vm128_vm2, %v1444_v16, %v972_v17  ;;  %s987_s5 = smov 12 }
  0x6a   :  { %v1426_v4 = vld [vmem:[%s2648_s0 + $0x101] ss:$16 sm:%s892_s6]   ;;  %v931_v5 = vsel %vm128_vm2, %v1434_v2, %v926_v3  ;;  %v1436_v18 = vld [vmem:[%s2648_s0 + $0x5] ss:$16 sm:%s938_s4]   ;;  %s1199_s6 = smov 48 }
  0x6b   :  { %v1427_v6 = vld [vmem:[%s2648_s0 + $0x101] ss:$16 sm:%s895_s14]   ;;  %932 = vrot.lane.b32.xlu1 %v931_v5, %s1501_s7  ;;  %v944_v22 = vsel %vm118_vm0, %v1437_v20, %v1436_v18  ;;  %s1158_s14 = smov 192 }
  0x6c   :  { %v1428_v7 = vld [vmem:[%s2648_s0 + $0x101] ss:$16 sm:%s900_s15]   ;;  %v898_v8 = vsel %vm118_vm0, %v1427_v6, %v1426_v4  ;;  %v1438_v21 = vld [vmem:[%s2648_s0 + $0x5] ss:$16 sm:%s946_s11]   ;;  %s1053_s15 = smov 3  ;;  %s1099_s11 = smov 3 }
  0x6d   :  { %v1429_v9 = vld [vmem:[%s2648_s0 + $0x101] ss:$16 sm:%s905_s20]   ;;  %v903_v10 = vsel %vm123_vm1, %v1428_v7, %v898_v8  ;;  %s1010_s20 = smov 12  ;;  %v1439_v23 = vld [vmem:[%s2648_s0 + $0x5] ss:$16 sm:%s951_s16]   ;;  %v949_v24 = vsel %vm123_vm1, %v1438_v21, %v944_v22  ;;  %s1056_s16 = smov 12 }
  0x6e   :  { %v908_v13 = vsel %vm128_vm2, %v1429_v9, %v903_v10  ;;  %v1451_v25 = vld [vmem:[%s2648_s0 + $0x185] ss:$16 sm:%s1007_s19]   ;;  %v954_v27 = vsel %vm128_vm2, %v1439_v23, %v949_v24  ;;  %v1461_v39 = vld [vmem:[%s2648_s0 + $0x89] ss:$16 sm:%s1053_s15]   ;;  %s1176_s19 = smov 48 }
  0x6f   :  { %909 = vrot.lane.b32.xlu0 %v908_v13, %s1501_s7  ;;  %978 = vrot.lane.b32.xlu1 %v977_v19, %s1501_s7  ;;  %v1452_v26 = vld [vmem:[%s2648_s0 + $0x185] ss:$16 sm:%s1010_s20]  }
  0x70   :  { %v1013_v28 = vsel %vm118_vm0, %v1452_v26, %v1451_v25  ;;  %v1453_v29 = vld [vmem:[%s2648_s0 + $0x185] ss:$16 sm:%s1015_s25]   ;;  %s1030_s25 = smov 3  ;;  %v1462_v40 = vld [vmem:[%s2648_s0 + $0x89] ss:$16 sm:%s1056_s16]  }
  0x71   :  { %v1454_v30 = vld [vmem:[%s2648_s0 + $0x185] ss:$16 sm:%s1020_s26]   ;;  %v1018_v31 = vsel %vm123_vm1, %v1453_v29, %v1013_v28  ;;  %v1059_v42 = vsel %vm118_vm0, %v1462_v40, %v1461_v39  ;;  %v1463_v43 = vld [vmem:[%s2648_s0 + $0x89] ss:$16 sm:%s1061_s21]   ;;  %s1076_s21 = smov 3  ;;  %s1079_s26 = smov 12 }
  0x72   :  { %v1446_v32 = vld [vmem:[%s2648_s0 + $0x105] ss:$16 sm:%s984_s29]   ;;  %v1023_v33 = vsel %vm128_vm2, %v1454_v30, %v1018_v31  ;;  %v1464_v44 = vld [vmem:[%s2648_s0 + $0x89] ss:$16 sm:%s1066_s22]   ;;  %v1064_v45 = vsel %vm123_vm1, %v1463_v43, %v1059_v42  ;;  %s1125_s22 = smov 12 }
  0x73   :  { %955 = vrot.lane.b32.xlu0 %v954_v27, %s1501_s7  ;;  %v1447_v34 = vld [vmem:[%s2648_s0 + $0x105] ss:$16 sm:%s987_s5]   ;;  %1024 = vrot.lane.b32.xlu1 %v1023_v33, %s1501_s7  ;;  %v1069_v47 = vsel %vm128_vm2, %v1464_v44, %v1064_v45 }
  0x74   :  { %v1448_v35 = vld [vmem:[%s2648_s0 + $0x105] ss:$16 sm:%s992_s8]   ;;  %v990_v36 = vsel %vm118_vm0, %v1447_v34, %v1446_v32  ;;  %v1456_v46 = vld [vmem:[%s2648_s0 + $0x9] ss:$16 sm:%s1030_s25]   ;;  %s1145_s8 = smov 3 }
  0x75   :  { %v1449_v37 = vld [vmem:[%s2648_s0 + $0x105] ss:$16 sm:%s997_s12]   ;;  %v995_v38 = vsel %vm123_vm1, %v1448_v35, %v990_v36  ;;  %s1102_s12 = smov 12  ;;  %v1457_v48 = vld [vmem:[%s2648_s0 + $0x9] ss:$16 sm:%s1033_s30]  }
  0x76   :  { %v1000_v41 = vsel %vm128_vm2, %v1449_v37, %v995_v38  ;;  %v1458_v49 = vld [vmem:[%s2648_s0 + $0x9] ss:$16 sm:%s1038_s2]   ;;  %v1036_v50 = vsel %vm118_vm0, %v1457_v48, %v1456_v46  ;;  %v1481_v3 = vld [vmem:[%s2648_s0 + $0x8d] ss:$16 sm:%s1145_s8]   ;;  %s1191_s2 = smov 3 }
  0x77   :  { %1001 = vrot.lane.b32.xlu0 %v1000_v41, %s1501_s7  ;;  %1070 = vrot.lane.b32.xlu1 %v1069_v47, %s1501_s7  ;;  %v1459_v51 = vld [vmem:[%s2648_s0 + $0x9] ss:$16 sm:%s1043_s9]   ;;  %v1041_v52 = vsel %vm123_vm1, %v1458_v49, %v1036_v50  ;;  %s1148_s9 = smov 12 }
  0x78   :  { %v1471_v53 = vld [vmem:[%s2648_s0 + $0x189] ss:$16 sm:%s1099_s11]   ;;  %v1046_v55 = vsel %vm128_vm2, %v1459_v51, %v1041_v52  ;;  %v1482_v4 = vld [vmem:[%s2648_s0 + $0x8d] ss:$16 sm:%s1148_s9]   ;;  %v176_v30 = vpop.permute.xlu1 %175  }
  0x79   :  { %v1472_v54 = vld [vmem:[%s2648_s0 + $0x189] ss:$16 sm:%s1102_s12]   ;;  %v1151_v6 = vsel %vm118_vm0, %v1482_v4, %v1481_v3  ;;  %v1483_v7 = vld [vmem:[%s2648_s0 + $0x8d] ss:$16 sm:%s1153_s13]   ;;  %s1168_s13 = smov 3 }
  0x7a   :  { %v1105_v56 = vsel %vm118_vm0, %v1472_v54, %v1471_v53  ;;  %v1473_v57 = vld [vmem:[%s2648_s0 + $0x189] ss:$16 sm:%s1107_s17]   ;;  %s1122_s17 = smov 3  ;;  %v1484_v8 = vld [vmem:[%s2648_s0 + $0x8d] ss:$16 sm:%s1158_s14]   ;;  %v1156_v9 = vsel %vm123_vm1, %v1483_v7, %v1151_v6 }
  0x7b   :  { %v1474_v58 = vld [vmem:[%s2648_s0 + $0x189] ss:$16 sm:%s1112_s18]   ;;  %1047 = vrot.lane.b32.xlu0 %v1046_v55, %s1501_s7  ;;  %v1110_v59 = vsel %vm123_vm1, %v1473_v57, %v1105_v56  ;;  %v1161_v11 = vsel %vm128_vm2, %v1484_v8, %v1156_v9  ;;  %s1171_s18 = smov 12  ;;  %1272 = vst.msk [vmem:[%s2649_s1 + $0x40] sm:$0xff] %vm132_vm4, %v176_v30  }
  0x7c   :  { %v1466_v60 = vld [vmem:[%s2648_s0 + $0x109] ss:$16 sm:%s1076_s21]   ;;  %v1115_v61 = vsel %vm128_vm2, %v1474_v58, %v1110_v59  ;;  %v1476_v10 = vld [vmem:[%s2648_s0 + $0xd] ss:$16 sm:%s1122_s17]   ;;  %v131_v33 = vpop.permute.xlu0 %130  }
  0x7d   :  { %v1467_v62 = vld [vmem:[%s2648_s0 + $0x109] ss:$16 sm:%s1079_s26]   ;;  %1116 = vrot.lane.b32.xlu1 %v1115_v61, %s1501_s7  ;;  %133 = vst.msk [vmem:[%s2649_s1] sm:$0xff] %vm132_vm4, %v131_v33  }
  0x7e   :  { %v1468_v63 = vld [vmem:[%s2648_s0 + $0x109] ss:$16 sm:%s1084_s27]   ;;  %v1082_v0 = vsel %vm118_vm0, %v1467_v62, %v1466_v60  ;;  %v1477_v12 = vld [vmem:[%s2648_s0 + $0xd] ss:$16 sm:%s1125_s22]  }
  0x7f   :  { %v1469_v1 = vld [vmem:[%s2648_s0 + $0x109] ss:$16 sm:%s1089_s3]   ;;  %v1087_v2 = vsel %vm123_vm1, %v1468_v63, %v1082_v0  ;;  %s1194_s3 = smov 12  ;;  %v1478_v13 = vld [vmem:[%s2648_s0 + $0xd] ss:$16 sm:%s1130_s23]   ;;  %v1128_v14 = vsel %vm118_vm0, %v1477_v12, %v1476_v10 }
  0x80   :  { %v1092_v5 = vsel %vm128_vm2, %v1469_v1, %v1087_v2  ;;  %v1479_v15 = vld [vmem:[%s2648_s0 + $0xd] ss:$16 sm:%s1135_s28]   ;;  %v1133_v16 = vsel %vm123_vm1, %v1478_v13, %v1128_v14  ;;  %v199_v34 = vpop.permute.xlu1 %198  }
  0x81   :  { %1093 = vrot.lane.b32.xlu0 %v1092_v5, %s1501_s7  ;;  %1162 = vrot.lane.b32.xlu1 %v1161_v11, %s1501_s7  ;;  %v1491_v17 = vld [vmem:[%s2648_s0 + $0x18d] ss:$16 sm:%s1191_s2]   ;;  %v1138_v19 = vsel %vm128_vm2, %v1479_v15, %v1133_v16 }
  0x82   :  { %v1492_v18 = vld [vmem:[%s2648_s0 + $0x18d] ss:$16 sm:%s1194_s3]   ;;  %1277 = vst.msk [vmem:[%s2649_s1 + $0x60] sm:$0xff] %vm132_vm4, %v199_v34  }
  0x83   :  { %v1197_v20 = vsel %vm118_vm0, %v1492_v18, %v1491_v17  ;;  %v1493_v21 = vld [vmem:[%s2648_s0 + $0x18d] ss:$16 sm:%s1199_s6]  }
  0x84   :  { %v1494_v22 = vld [vmem:[%s2648_s0 + $0x18d] ss:$16 sm:%s1204_s10]   ;;  %v1202_v23 = vsel %vm123_vm1, %v1493_v21, %v1197_v20  ;;  %v153_v35 = vpop.permute.xlu0 %152   ;;  %v245_v36 = vpop.permute.xlu1 %244  }
  0x85   :  { %1139 = vrot.lane.b32.xlu0 %v1138_v19, %s1501_s7  ;;  %v1486_v24 = vld [vmem:[%s2648_s0 + $0x10d] ss:$16 sm:%s1168_s13]   ;;  %v1207_v25 = vsel %vm128_vm2, %v1494_v22, %v1202_v23  ;;  %1267 = vst.msk [vmem:[%s2649_s1 + $0x20] sm:$0xff] %vm132_vm4, %v153_v35  }
  0x86   :  { %v1487_v26 = vld [vmem:[%s2648_s0 + $0x10d] ss:$16 sm:%s1171_s18]   ;;  %1208 = vrot.lane.b32.xlu1 %v1207_v25, %s1501_s7  ;;  %1287 = vst.msk [vmem:[%s2649_s1 + $0x28] sm:$0xff] %vm132_vm4, %v245_v36  }
  0x87   :  { %v1488_v27 = vld [vmem:[%s2648_s0 + $0x10d] ss:$16 sm:%s1176_s19]   ;;  %v1174_v28 = vsel %vm118_vm0, %v1487_v26, %v1486_v24 }
  0x88   :  { %v1489_v29 = vld [vmem:[%s2648_s0 + $0x10d] ss:$16 sm:%s1181_s24]   ;;  %v1179_v31 = vsel %vm123_vm1, %v1488_v27, %v1174_v28  ;;  %v222_v37 = vpop.permute.xlu0 %221  }
  0x89   :  { %v1184_v32 = vsel %vm128_vm2, %v1489_v29, %v1179_v31  ;;  %1282 = vst.msk [vmem:[%s2649_s1 + $0x8] sm:$0xff] %vm132_vm4, %v222_v37  }
  0x8a   :  { %1185 = vrot.lane.b32.xlu0 %v1184_v32, %s1501_s7  ;;  %v291_v38 = vpop.permute.xlu1 %290  }
  0x8b   :  { %1297 = vst.msk [vmem:[%s2649_s1 + $0x68] sm:$0xff] %vm132_vm4, %v291_v38  }
  0x8e   :  { %v268_v39 = vpop.permute.xlu0 %267   ;;  %v337_v40 = vpop.permute.xlu1 %336  }
  0x8f   :  { %1292 = vst.msk [vmem:[%s2649_s1 + $0x48] sm:$0xff] %vm132_vm4, %v268_v39   ;;  %1307 = vst.msk [vmem:[%s2649_s1 + $0x30] sm:$0xff] %vm132_vm4, %v337_v40  }
  0x92   :  { %v314_v41 = vpop.permute.xlu0 %313  }
  0x93   :  { %1302 = vst.msk [vmem:[%s2649_s1 + $0x10] sm:$0xff] %vm132_vm4, %v314_v41  }
  0x95   :  { %v383_v42 = vpop.permute.xlu1 %382  }
  0x96   :  { %1317 = vst.msk [vmem:[%s2649_s1 + $0x70] sm:$0xff] %vm132_vm4, %v383_v42  }
  0x99   :  { %v360_v43 = vpop.permute.xlu0 %359   ;;  %v429_v44 = vpop.permute.xlu1 %428  }
  0x9a   :  { %1312 = vst.msk [vmem:[%s2649_s1 + $0x50] sm:$0xff] %vm132_vm4, %v360_v43   ;;  %1327 = vst.msk [vmem:[%s2649_s1 + $0x38] sm:$0xff] %vm132_vm4, %v429_v44  }
  0x9d   :  { %v406_v45 = vpop.permute.xlu0 %405  }
  0x9e   :  { %1322 = vst.msk [vmem:[%s2649_s1 + $0x18] sm:$0xff] %vm132_vm4, %v406_v45  }
  0xa1   :  { %v475_v46 = vpop.permute.xlu1 %474  }
  0xa2   :  { %1337 = vst.msk [vmem:[%s2649_s1 + $0x78] sm:$0xff] %vm132_vm4, %v475_v46  }
  0xa5   :  { %v452_v47 = vpop.permute.xlu0 %451  }
  0xa6   :  { %1332 = vst.msk [vmem:[%s2649_s1 + $0x58] sm:$0xff] %vm132_vm4, %v452_v47  }
  0xa7   :  { %v520_v48 = vpop.permute.xlu1 %519  }
  0xa8   :  { %1346 = vst.msk [vmem:[%s2649_s1 + $0x20] sm:$0xff] %vm499_vm5, %v520_v48  }
  0xab   :  { %v498_v49 = vpop.permute.xlu0 %497  }
  0xac   :  { %500 = vst.msk [vmem:[%s2649_s1] sm:$0xff] %vm499_vm5, %v498_v49  }
  0xaf   :  { %v566_v50 = vpop.permute.xlu1 %565  }
  0xb0   :  { %1356 = vst.msk [vmem:[%s2649_s1 + $0x60] sm:$0xff] %vm499_vm5, %v566_v50  }
  0xb3   :  { %v543_v51 = vpop.permute.xlu0 %542  }
  0xb4   :  { %1351 = vst.msk [vmem:[%s2649_s1 + $0x40] sm:$0xff] %vm499_vm5, %v543_v51  }
  0xb5   :  { %v612_v52 = vpop.permute.xlu1 %611  }
  0xb6   :  { %1366 = vst.msk [vmem:[%s2649_s1 + $0x28] sm:$0xff] %vm499_vm5, %v612_v52  }
  0xb9   :  { %v589_v53 = vpop.permute.xlu0 %588  }
  0xba   :  { %1361 = vst.msk [vmem:[%s2649_s1 + $0x8] sm:$0xff] %vm499_vm5, %v589_v53  }
  0xbd   :  { %v658_v54 = vpop.permute.xlu1 %657  }
  0xbe   :  { %1376 = vst.msk [vmem:[%s2649_s1 + $0x68] sm:$0xff] %vm499_vm5, %v658_v54  }
  0xc1   :  { %v635_v55 = vpop.permute.xlu0 %634  }
  0xc2   :  { %1371 = vst.msk [vmem:[%s2649_s1 + $0x48] sm:$0xff] %vm499_vm5, %v635_v55  }
  0xc3   :  { %v704_v56 = vpop.permute.xlu1 %703  }
  0xc4   :  { %1386 = vst.msk [vmem:[%s2649_s1 + $0x30] sm:$0xff] %vm499_vm5, %v704_v56  }
  0xc7   :  { %v681_v57 = vpop.permute.xlu0 %680  }
  0xc8   :  { %1381 = vst.msk [vmem:[%s2649_s1 + $0x10] sm:$0xff] %vm499_vm5, %v681_v57  }
  0xcb   :  { %v750_v58 = vpop.permute.xlu1 %749  }
  0xcc   :  { %1396 = vst.msk [vmem:[%s2649_s1 + $0x70] sm:$0xff] %vm499_vm5, %v750_v58  }
  0xcf   :  { %v727_v59 = vpop.permute.xlu0 %726   ;;  %v796_v60 = vpop.permute.xlu1 %795  }
  0xd0   :  { %1391 = vst.msk [vmem:[%s2649_s1 + $0x50] sm:$0xff] %vm499_vm5, %v727_v59   ;;  %1406 = vst.msk [vmem:[%s2649_s1 + $0x38] sm:$0xff] %vm499_vm5, %v796_v60  }
  0xd3   :  { %v773_v61 = vpop.permute.xlu0 %772   ;;  %v842_v62 = vpop.permute.xlu1 %841  }
  0xd4   :  { %1401 = vst.msk [vmem:[%s2649_s1 + $0x18] sm:$0xff] %vm499_vm5, %v773_v61   ;;  %1416 = vst.msk [vmem:[%s2649_s1 + $0x78] sm:$0xff] %vm499_vm5, %v842_v62  }
  0xd7   :  { %v819_v63 = vpop.permute.xlu0 %818   ;;  %v887_v0 = vpop.permute.xlu1 %886  }
  0xd8   :  { %1411 = vst.msk [vmem:[%s2649_s1 + $0x58] sm:$0xff] %vm499_vm5, %v819_v63  }
  0xd9   :  { %1425 = vst.msk [vmem:[%s2649_s1 + $0x20] sm:$0xff] %vm866_vm6, %v887_v0  }
  0xdb   :  { %v865_v1 = vpop.permute.xlu0 %864  }
  0xdc   :  { %867 = vst.msk [vmem:[%s2649_s1] sm:$0xff] %vm866_vm6, %v865_v1  }
  0xdd   :  { %v933_v2 = vpop.permute.xlu1 %932  }
  0xde   :  { %1435 = vst.msk [vmem:[%s2649_s1 + $0x60] sm:$0xff] %vm866_vm6, %v933_v2  }
  0xe1   :  { %v910_v3 = vpop.permute.xlu0 %909   ;;  %v979_v4 = vpop.permute.xlu1 %978  }
  0xe2   :  { %1430 = vst.msk [vmem:[%s2649_s1 + $0x40] sm:$0xff] %vm866_vm6, %v910_v3   ;;  %1445 = vst.msk [vmem:[%s2649_s1 + $0x28] sm:$0xff] %vm866_vm6, %v979_v4  }
  0xe5   :  { %v956_v5 = vpop.permute.xlu0 %955   ;;  %v1025_v6 = vpop.permute.xlu1 %1024  }
  0xe6   :  { %1440 = vst.msk [vmem:[%s2649_s1 + $0x8] sm:$0xff] %vm866_vm6, %v956_v5   ;;  %1455 = vst.msk [vmem:[%s2649_s1 + $0x68] sm:$0xff] %vm866_vm6, %v1025_v6  }
  0xe9   :  { %v1002_v7 = vpop.permute.xlu0 %1001   ;;  %v1071_v8 = vpop.permute.xlu1 %1070  }
  0xea   :  { %1450 = vst.msk [vmem:[%s2649_s1 + $0x48] sm:$0xff] %vm866_vm6, %v1002_v7   ;;  %1465 = vst.msk [vmem:[%s2649_s1 + $0x30] sm:$0xff] %vm866_vm6, %v1071_v8  }
  0xed   :  { %v1048_v9 = vpop.permute.xlu0 %1047  }
  0xee   :  { %1460 = vst.msk [vmem:[%s2649_s1 + $0x10] sm:$0xff] %vm866_vm6, %v1048_v9  }
  0xef   :  { %v1117_v10 = vpop.permute.xlu1 %1116  }
  0xf0   :  { %1475 = vst.msk [vmem:[%s2649_s1 + $0x70] sm:$0xff] %vm866_vm6, %v1117_v10  }
  0xf3   :  { %v1094_v11 = vpop.permute.xlu0 %1093   ;;  %v1163_v12 = vpop.permute.xlu1 %1162  }
  0xf4   :  { %1470 = vst.msk [vmem:[%s2649_s1 + $0x50] sm:$0xff] %vm866_vm6, %v1094_v11   ;;  %1485 = vst.msk [vmem:[%s2649_s1 + $0x38] sm:$0xff] %vm866_vm6, %v1163_v12  }
  0xf7   :  { %v1140_v13 = vpop.permute.xlu0 %1139  }
  0xf8   :  { %1480 = vst.msk [vmem:[%s2649_s1 + $0x18] sm:$0xff] %vm866_vm6, %v1140_v13   ;;  %v1209_v14 = vpop.permute.xlu1 %1208  }
  0xf9   :  { %1495 = vst.msk [vmem:[%s2649_s1 + $0x78] sm:$0xff] %vm866_vm6, %v1209_v14  }
  0xfc   :  { %v1186_v15 = vpop.permute.xlu0 %1185  }
  0xfd   :  { %1490 = vst.msk [vmem:[%s2649_s1 + $0x58] sm:$0xff] %vm866_vm6, %v1186_v15  }

// kernel: ctfa_forward.1
= control target key start
LH: loop header
LB: loop body
LE: loop exit
PB: predicated region body
PF: predicated region fallthrough
CT: control target
= control target key end

     0   :  { %s2547_s21 = smov 0   ;;  %s3695_s0 = inlined_call_operand.vmem [shape: f32[2,4,512], index: 0, kind: input, shape index: {}]   ;;  %s3696_s1 = inlined_call_operand.vmem [shape: f32[512,32], index: 1, kind: input, shape index: {}]   ;;  %s3697_s2 = inlined_call_operand.vmem [shape: f32[32,512], index: 2, kind: input, shape index: {}]   ;;  %s3698_s3 = inlined_call_operand.vmem [shape: f32[512,512], index: 3, kind: input, shape index: {}]   ;;  %s3699_s4 = inlined_call_operand.vmem [shape: f32[16,4], index: 4, kind: input, shape index: {}]   ;;  %s3700_s5 = inlined_call_operand.vmem [shape: f32[16,1], index: 5, kind: input, shape index: {}]   ;;  %s3701_s6 = inlined_call_operand.vmem [shape: f32[4,16], index: 6, kind: input, shape index: {}]   ;;  %s3702_s7 = inlined_call_operand.vmem [shape: f32[4,1], index: 7, kind: input, shape index: {}]   ;;  %s3703_s8 = inlined_call_operand.vmem [shape: f32[16,4], index: 8, kind: input, shape index: {}]   ;;  %s3704_s9 = inlined_call_operand.vmem [shape: f32[16,1], index: 9, kind: input, shape index: {}]   ;;  %s3705_s10 = inlined_call_operand.vmem [shape: f32[4,16], index: 10, kind: input, shape index: {}]   ;;  %s3706_s11 = inlined_call_operand.vmem [shape: f32[4,1], index: 11, kind: input, shape index: {}]   ;;  %s3707_s12 = inlined_call_operand.vmem [shape: f32[2,4,512], index: 12, kind: output, shape index: {}]  }
   0x1 LB: > { %s1964_s22 = sadd.s32 4294967295, %s2476_s21   ;;  %p1968_p0 = scmp.ge.s32.totalorder %s2476_s21, 1  ;;  %s2476_s21 = sphi %s2547_s21, %s22_s21  }
   0x2   : > { %p362_p1 = scmp.lt.s32.totalorder %s2476_s21, 3 }
   0x4   : > { %p363_p2 = pnand %p1968_p0, %p362_p1 }
   0x5   : > { %v432_v0 = vld [vmem:[%s3696_s1 + $0x80] sm:$0xff] (!%p363_p2)  ;;  %v433_v1 = vld [vmem:[%s3696_s1 + $0x88] sm:$0xff] (!%p363_p2)  ;;  %v434_v11 = vld [vmem:[%s3696_s1 + $0x90] sm:$0xff] (!%p363_p2)  ;;  %p2629_p3 = scmp.lt.s32.totalorder (!%p363_p2), %s1964_s22, 1  ;;  %vm640_vm0 = vcmask (!%p363_p2), 31744   ;;  %vm647_vm1 = vcmask (!%p363_p2), 1043456  }
   0x6   : > { %366 = sbr.rel (%p363_p2) target bundleno = 1547 (0x60b), region = 68  ;;  %v464_v2 = vld [vmem:[%s3696_s1 + $0x180] sm:$0xff] (!%p363_p2)  ;;  %v2081_v3 = vpack.c.bf16 (!%p363_p2), %v433_v1, %v432_v0  ;;  %v465_v4 = vld [vmem:[%s3696_s1 + $0x188] sm:$0xff] (!%p363_p2)  ;;  %v435_v13 = vld [vmem:[%s3696_s1 + $0x98] sm:$0xff] (!%p363_p2)  ;;  %vm2480_vm2 = vmmov (!%p363_p2), 0   ;;  %vm735_vm3 = vcmask (!%p363_p2), 130048  }
   0x7   : > { %v416_v5 = vld [vmem:[%s3696_s1] sm:$0xff] (!%p363_p2)  ;;  %v417_v6 = vld [vmem:[%s3696_s1 + $0x8] sm:$0xff] (!%p363_p2)  ;;  %v2113_v7 = vpack.c.bf16 (!%p363_p2), %v465_v4, %v464_v2  ;;  %v466_v14 = vld [vmem:[%s3696_s1 + $0x190] sm:$0xff] (!%p363_p2)  ;;  %v2085_v16 = vpack.c.bf16 (!%p363_p2), %v435_v13, %v434_v11  ;;  %vm831_vm4 = vcmask (!%p363_p2), 261120  }
   0x8   : > { %v2083_v8 = vpack.c.bf16 (!%p363_p2), %v417_v6, %v416_v5  ;;  %v448_v9 = vld [vmem:[%s3696_s1 + $0x100] sm:$0xff] (!%p363_p2)  ;;  %v449_v10 = vld [vmem:[%s3696_s1 + $0x108] sm:$0xff] (!%p363_p2)  ;;  %2082 = vmatprep.subr.bf16.mxu0 (!%p363_p2), %v2081_v3  ;;  %v467_v15 = vld [vmem:[%s3696_s1 + $0x198] sm:$0xff] (!%p363_p2) }
   0x9   : > { %v2115_v12 = vpack.c.bf16 (!%p363_p2), %v449_v10, %v448_v9  ;;  %2114 = vmatprep.subr.bf16.mxu1 (!%p363_p2), %v2113_v7  ;;  %v2117_v17 = vpack.c.bf16 (!%p363_p2), %v467_v15, %v466_v14  ;;  %v418_v18 = vld [vmem:[%s3696_s1 + $0x10] sm:$0xff] (!%p363_p2)  ;;  %v419_v19 = vld [vmem:[%s3696_s1 + $0x18] sm:$0xff] (!%p363_p2)  ;;  %v436_v23 = vld [vmem:[%s3696_s1 + $0xa0] sm:$0xff] (!%p363_p2) }
   0xa   : > { %2084 = vmatpush3.bf16.msra.mxu0 (!%p363_p2), %v2083_v8  ;;  %v450_v20 = vld [vmem:[%s3696_s1 + $0x110] sm:$0xff] (!%p363_p2)  ;;  %v2087_v21 = vpack.c.bf16 (!%p363_p2), %v419_v19, %v418_v18  ;;  %v451_v22 = vld [vmem:[%s3696_s1 + $0x118] sm:$0xff] (!%p363_p2)  ;;  %v437_v24 = vld [vmem:[%s3696_s1 + $0xa8] sm:$0xff] (!%p363_p2) }
   0xb   : > { %2116 = vmatpush3.bf16.msra.mxu1 (!%p363_p2), %v2115_v12  ;;  %2086 = vmatprep.subr.bf16.mxu0 (!%p363_p2), %v2085_v16  ;;  %v2119_v25 = vpack.c.bf16 (!%p363_p2), %v451_v22, %v450_v20  ;;  %v2089_v26 = vpack.c.bf16 (!%p363_p2), %v437_v24, %v436_v23  ;;  %v468_v27 = vld [vmem:[%s3696_s1 + $0x1a0] sm:$0xff] (!%p363_p2)  ;;  %v469_v28 = vld [vmem:[%s3696_s1 + $0x1a8] sm:$0xff] (!%p363_p2)  ;;  %v438_v35 = vld [vmem:[%s3696_s1 + $0xb0] sm:$0xff] (!%p363_p2) }
   0xc   : > { %2118 = vmatprep.subr.bf16.mxu1 (!%p363_p2), %v2117_v17  ;;  %v420_v29 = vld [vmem:[%s3696_s1 + $0x20] sm:$0xff] (!%p363_p2)  ;;  %v2121_v30 = vpack.c.bf16 (!%p363_p2), %v469_v28, %v468_v27  ;;  %v421_v31 = vld [vmem:[%s3696_s1 + $0x28] sm:$0xff] (!%p363_p2)  ;;  %v439_v36 = vld [vmem:[%s3696_s1 + $0xb8] sm:$0xff] (!%p363_p2) }
   0xd   : > { %v452_v32 = vld [vmem:[%s3696_s1 + $0x120] sm:$0xff]  ;;  %v453_v33 = vld [vmem:[%s3696_s1 + $0x128] sm:$0xff]  ;;  %v2091_v34 = vpack.c.bf16 %v421_v31, %v420_v29  ;;  %v470_v37 = vld [vmem:[%s3696_s1 + $0x1b0] sm:$0xff]  ;;  %v2093_v39 = vpack.c.bf16 %v439_v36, %v438_v35  ;;  %s3710_s22 = smov (!%p2629_p3, %s1964_s22), 1 }
   0xe   : > { %2088 = vmatpush3.bf16.msra.mxu0 %v2087_v21  ;;  %v2123_v38 = vpack.c.bf16 %v453_v33, %v452_v32  ;;  %v471_v40 = vld [vmem:[%s3696_s1 + $0x1b8] sm:$0xff]  ;;  %v422_v41 = vld [vmem:[%s3696_s1 + $0x30] sm:$0xff]  ;;  %v440_v46 = vld [vmem:[%s3696_s1 + $0xc0] sm:$0xff]  ;;  %s1991_s15 = sshll.u32 %s3710_s22, 4 }
   0xf   : > { %2120 = vmatpush3.bf16.msra.mxu1 %v2119_v25  ;;  %2090 = vmatprep.subr.bf16.mxu0 %v2089_v26  ;;  %v423_v42 = vld [vmem:[%s3696_s1 + $0x38] sm:$0xff]  ;;  %v2125_v43 = vpack.c.bf16 %v471_v40, %v470_v37  ;;  %v454_v44 = vld [vmem:[%s3696_s1 + $0x130] sm:$0xff]  ;;  %v441_v47 = vld [vmem:[%s3696_s1 + $0xc8] sm:$0xff]  ;;  %s2723_s14 = scalar_lea.vmem %s3695_s0, %s1991_s15  ;;  %s413_s28 = scalar_lea.vmem %s3707_s12, %s1991_s15 }
  0x10   : > { %2122 = vmatprep.subr.bf16.mxu1 %v2121_v30  ;;  %v455_v45 = vld [vmem:[%s3696_s1 + $0x138] sm:$0xff]  ;;  %v472_v48 = vld [vmem:[%s3696_s1 + $0x1c0] sm:$0xff]  ;;  %v473_v49 = vld [vmem:[%s3696_s1 + $0x1c8] sm:$0xff]  ;;  %v2095_v50 = vpack.c.bf16 %v423_v42, %v422_v41  ;;  %v2097_v52 = vpack.c.bf16 %v441_v47, %v440_v46 }
  0x11   : > { %v2127_v51 = vpack.c.bf16 %v455_v45, %v454_v44  ;;  %v424_v53 = vld [vmem:[%s3696_s1 + $0x40] sm:$0xff]  ;;  %v425_v54 = vld [vmem:[%s3696_s1 + $0x48] sm:$0xff]  ;;  %v2129_v56 = vpack.c.bf16 %v473_v49, %v472_v48  ;;  %v442_v58 = vld [vmem:[%s3696_s1 + $0xd0] sm:$0xff]  ;;  %v2479_v49 = vmov 0.0|0.0  }
  0x12   : > { %2092 = vmatpush3.bf16.msra.mxu0 %v2091_v34  ;;  %v456_v55 = vld [vmem:[%s3696_s1 + $0x140] sm:$0xff]  ;;  %v457_v57 = vld [vmem:[%s3696_s1 + $0x148] sm:$0xff]  ;;  %v443_v59 = vld [vmem:[%s3696_s1 + $0xd8] sm:$0xff]  ;;  %v2099_v62 = vpack.c.bf16 %v425_v54, %v424_v53 }
  0x13   : > { %2124 = vmatpush3.bf16.msra.mxu1 %v2123_v38  ;;  %2094 = vmatprep.subr.bf16.mxu0 %v2093_v39  ;;  %v474_v60 = vld [vmem:[%s3696_s1 + $0x1d0] sm:$0xff]  ;;  %v475_v61 = vld [vmem:[%s3696_s1 + $0x1d8] sm:$0xff]  ;;  %v2131_v63 = vpack.c.bf16 %v457_v57, %v456_v55  ;;  %v2101_v0 = vpack.c.bf16 %v443_v59, %v442_v58  ;;  %v444_v6 = vld [vmem:[%s3696_s1 + $0xe0] sm:$0xff]  ;;  %v2478_v38 = vmov 0  }
  0x14   : > { %2126 = vmatprep.subr.bf16.mxu1 %v2125_v43  ;;  %v426_v1 = vld [vmem:[%s3696_s1 + $0x50] sm:$0xff]  ;;  %v427_v2 = vld [vmem:[%s3696_s1 + $0x58] sm:$0xff]  ;;  %v2133_v4 = vpack.c.bf16 %v475_v61, %v474_v60  ;;  %v445_v7 = vld [vmem:[%s3696_s1 + $0xe8] sm:$0xff]  ;;  %2444 = vset.pattern.permute.xlu0 %v2478_v38 }
  0x15   : > { %v458_v3 = vld [vmem:[%s3696_s1 + $0x150] sm:$0xff]  ;;  %v459_v5 = vld [vmem:[%s3696_s1 + $0x158] sm:$0xff]  ;;  %v476_v8 = vld [vmem:[%s3696_s1 + $0x1e0] sm:$0xff]  ;;  %v2103_v10 = vpack.c.bf16 %v427_v2, %v426_v1  ;;  %v2105_v14 = vpack.c.bf16 %v445_v7, %v444_v6  ;;  %2445 = vset.pattern.permute.xlu1 %v2478_v38 }
  0x16   : > { %2096 = vmatpush3.bf16.msra.mxu0 %v2095_v50  ;;  %v477_v9 = vld [vmem:[%s3696_s1 + $0x1e8] sm:$0xff]  ;;  %v428_v11 = vld [vmem:[%s3696_s1 + $0x60] sm:$0xff]  ;;  %v2135_v13 = vpack.c.bf16 %v459_v5, %v458_v3  ;;  %v446_v20 = vld [vmem:[%s3696_s1 + $0xf0] sm:$0xff]  ;;  %v2481_v50 = vmov 0.0  }
  0x17   : > { %2128 = vmatpush3.bf16.msra.mxu1 %v2127_v51  ;;  %2098 = vmatprep.subr.bf16.mxu0 %v2097_v52  ;;  %v429_v12 = vld [vmem:[%s3696_s1 + $0x68] sm:$0xff]  ;;  %v460_v15 = vld [vmem:[%s3696_s1 + $0x160] sm:$0xff]  ;;  %v2137_v18 = vpack.c.bf16 %v477_v9, %v476_v8  ;;  %v447_v21 = vld [vmem:[%s3696_s1 + $0xf8] sm:$0xff] }
  0x18   : > { %2130 = vmatprep.subr.bf16.mxu1 %v2129_v56  ;;  %v2741_v16 = vld [vmem:[%s2723_s14] sm:$0xff]  ;;  %v415_v17 = vld [vmem:[%s2723_s14 + $0x8] sm:$0xff]  ;;  %v478_v24 = vld [vmem:[%s3696_s1 + $0x1f0] sm:$0xff]  ;;  %v2107_v26 = vpack.c.bf16 %v429_v12, %v428_v11  ;;  %v2109_v28 = vpack.c.bf16 %v447_v21, %v446_v20 }
  0x19   : > { %v461_v19 = vld [vmem:[%s3696_s1 + $0x168] sm:$0xff]  ;;  %v2755_v22 = vcombine.high %v2741_v16, %v2741_v16  ;;  %v2757_v23 = vcombine.high %v415_v17, %v415_v17  ;;  %v479_v25 = vld [vmem:[%s3696_s1 + $0x1f8] sm:$0xff]  ;;  %v430_v29 = vld [vmem:[%s3696_s1 + $0x70] sm:$0xff] }
  0x1a   : > { %2100 = vmatpush3.bf16.msra.mxu0 %v2099_v62  ;;  %v2139_v27 = vpack.c.bf16 %v461_v19, %v460_v15  ;;  %v431_v30 = vld [vmem:[%s3696_s1 + $0x78] sm:$0xff]  ;;  %v2141_v31 = vpack.c.bf16 %v479_v25, %v478_v24  ;;  %v462_v32 = vld [vmem:[%s3696_s1 + $0x170] sm:$0xff]  ;;  %v626_v36 = vld [vmem:[%s3699_s4] sm:$0xff] }
  0x1b   : > { %2132 = vmatpush3.bf16.msra.mxu1 %v2131_v63  ;;  %2102 = vmatprep.subr.bf16.mxu0 %v2101_v0  ;;  %v463_v33 = vld [vmem:[%s3696_s1 + $0x178] sm:$0xff]  ;;  %v2111_v34 = vpack.c.bf16 %v431_v30, %v430_v29  ;;  %v628_v37 = vld [vmem:[%s3700_s5] sm:$0xff]  ;;  %v629_v39 = vld [vmem:[%s3700_s5 + $0x8] sm:$0xff] }
  0x1c   : > { %2134 = vmatprep.subr.bf16.mxu1 %v2133_v4  ;;  %550 = vmatprep.mubr.f32.mxu0 %v2755_v22  ;;  %v2143_v35 = vpack.c.bf16 %v463_v33, %v462_v32  ;;  %v1520_v40 = vld [vmem:[%s3704_s9 + $0x8] sm:$0xff]  ;;  %v729_v51 = vld [vmem:[%s3702_s7] sm:$0xf]  ;;  %v818_v2 = vld [vmem:[%s3697_s2 + $0x18] sm:$0xff] }
  0x1d   : > { %620 = vmatprep.mubr.f32.mxu1 %v2757_v23  ;;  %632 = vperm.xlu0 %2444, %v628_v37   ;;  %v627_v48 = vld [vmem:[%s3699_s4 + $0x8] sm:$0xff]  ;;  %v1519_v52 = vld [vmem:[%s3704_s9] sm:$0xff]  ;;  %v822_v4 = vld [vmem:[%s3697_s2 + $0x38] sm:$0xff] }
  0x1e   : > { %2104 = vmatpush3.bf16.msra.mxu0 %v2103_v10  ;;  %732 = vperm.xlu1 %2445, %v729_v51   ;;  %v1712_v53 = vld [vmem:[%s3706_s11] sm:$0xf]  ;;  %v816_v0 = vld [vmem:[%s3697_s2 + $0x8] sm:$0xff]  ;;  %v2156_v7 = vpack.c.bf16 %v822_v4, %v818_v2  ;;  %v817_v9 = vld [vmem:[%s3697_s2 + $0x10] sm:$0xff] }
  0x1f   : > { %2136 = vmatpush3.bf16.msra.mxu1 %v2135_v13  ;;  %2106 = vmatprep.subr.bf16.mxu0 %v2105_v14  ;;  %v728_v63 = vld [vmem:[%s3701_s6] sm:$0xf]  ;;  %v820_v1 = vld [vmem:[%s3697_s2 + $0x28] sm:$0xff]  ;;  %v821_v10 = vld [vmem:[%s3697_s2 + $0x30] sm:$0xff] }
  0x20   : > { %2138 = vmatprep.subr.bf16.mxu1 %v2137_v18  ;;  %v2148_v3 = vpack.c.bf16 %v820_v1, %v816_v0  ;;  %v815_v5 = vld [vmem:[%s3697_s2] sm:$0xff]  ;;  %v824_v11 = vld [vmem:[%s3697_s2 + $0x48] sm:$0xff]  ;;  %v2158_v12 = vpack.c.bf16 %v821_v10, %v817_v9  ;;  %v826_v14 = vld [vmem:[%s3697_s2 + $0x58] sm:$0xff] }
  0x21   : > { %637 = vperm.xlu0 %2444, %v629_v39   ;;  %v819_v6 = vld [vmem:[%s3697_s2 + $0x20] sm:$0xff]  ;;  %v828_v13 = vld [vmem:[%s3697_s2 + $0x68] sm:$0xff]  ;;  %v830_v15 = vld [vmem:[%s3697_s2 + $0x78] sm:$0xff] }
  0x22   : > { %2108 = vmatpush3.bf16.msra.mxu0 %v2107_v26  ;;  %1523 = vperm.xlu1 %2445, %v1519_v52   ;;  %v2150_v8 = vpack.c.bf16 %v819_v6, %v815_v5  ;;  %v2160_v18 = vpack.c.bf16 %v830_v15, %v826_v14  ;;  %v823_v19 = vld [vmem:[%s3697_s2 + $0x40] sm:$0xff]  ;;  %v825_v21 = vld [vmem:[%s3697_s2 + $0x50] sm:$0xff]  ;;  %v978_v26 = vld [vmem:[%s3698_s3 + $0x8] sm:$0xff] }
  0x23   : > { %2140 = vmatpush3.bf16.msra.mxu1 %v2139_v27  ;;  %2110 = vmatprep.subr.bf16.mxu0 %v2109_v28  ;;  %v827_v20 = vld [vmem:[%s3697_s2 + $0x60] sm:$0xff]  ;;  %v829_v25 = vld [vmem:[%s3697_s2 + $0x70] sm:$0xff]  ;;  %v982_v27 = vld [vmem:[%s3698_s3 + $0x28] sm:$0xff] }
  0x24   : > { %2142 = vmatprep.subr.bf16.mxu1 %v2141_v31  ;;  %v2154_v24 = vpack.c.bf16 %v827_v20, %v823_v19  ;;  %v2162_v28 = vpack.c.bf16 %v829_v25, %v825_v21  ;;  %v2164_v29 = vpack.c.bf16 %v982_v27, %v978_v26  ;;  %v980_v30 = vld [vmem:[%s3698_s3 + $0x18] sm:$0xff]  ;;  %v985_v52 = vld [vmem:[%s3698_s3 + $0x40] sm:$0xff]  ;;  %v995_v5 = vld [vmem:[%s3698_s3 + $0x90] sm:$0xff] }
  0x25   : > { %1528 = vperm.xlu0 %2444, %v1520_v40   ;;  %v984_v31 = vld [vmem:[%s3698_s3 + $0x38] sm:$0xff]  ;;  %v993_v1 = vld [vmem:[%s3698_s3 + $0x80] sm:$0xff]  ;;  %v999_v6 = vld [vmem:[%s3698_s3 + $0xb0] sm:$0xff] }
  0x26   : > { %2112 = vmatpush3.bf16.msra.mxu0 %v2111_v34  ;;  %1715 = vperm.xlu1 %2445, %v1712_v53   ;;  %v2292_v32 = vpack.c.bf16 %v984_v31, %v980_v30  ;;  %v989_v53 = vld [vmem:[%s3698_s3 + $0x60] sm:$0xff]  ;;  %v1004_v9 = vld [vmem:[%s3698_s3 + $0xd8] sm:$0xff]  ;;  %v1010_v19 = vld [vmem:[%s3698_s3 + $0x108] sm:$0xff] }
  0x27   : > { %2144 = vmatpush3.bf16.msra.mxu1 %v2143_v35  ;;  %v997_v2 = vld [vmem:[%s3698_s3 + $0xa0] sm:$0xff]  ;;  %v1008_v10 = vld [vmem:[%s3698_s3 + $0xf8] sm:$0xff]  ;;  %v1014_v20 = vld [vmem:[%s3698_s3 + $0x128] sm:$0xff] }
  0x28   : > { %2145 = vmatprep.subr.bf16.mxu1 %v2479_v49  ;;  %v1005_v14 = vld [vmem:[%s3698_s3 + $0xe0] sm:$0xff]  ;;  %v1012_v21 = vld [vmem:[%s3698_s3 + $0x118] sm:$0xff]  ;;  %v1011_v31 = vld [vmem:[%s3698_s3 + $0x110] sm:$0xff] }
  0x29   : > { %551 = vmatmul.mubr.f32.vlgmr.msra.gmra.mrb[0].mxu0 %v2741_v16  ;;  %v1009_v27 = vld [vmem:[%s3698_s3 + $0x100] sm:$0xff] }
  0x2a   : > { %621 = vmatmul.mubr.f32.vlgmr.msra.gmra.mrb[0].mxu1 %v415_v17  ;;  %2071 = vmatprep.mubr.msk.f32.mxu0 %vm640_vm0, %v626_v36  ;;  %v2152_v17 = vpack.c.bf16 %v828_v13, %v824_v11  ;;  %v2174_v11 = vpack.c.bf16 %v997_v2, %v993_v1  ;;  %v1001_v13 = vld [vmem:[%s3698_s3 + $0xc0] sm:$0xff] }
  0x2b   : > { %2078 = vmatprep.mubr.msk.f32.mxu1 %vm2480_vm2, %v2481_v50  ;;  %v2178_v25 = vpack.c.bf16 %v1005_v14, %v1001_v13  ;;  %v1037_v1 = vld [vmem:[%s3698_s3 + $0x1e0] sm:$0xff] }
  0x2c   : > { %v1045_v13 = vld [vmem:[%s3698_s3 + $0x220] sm:$0xff] }
  0x9c   : > { %v633_v54 = vpop.permute.xlu0 %632 }
  0x9d   : > { %v733_v33 = vpop.permute.xlu1 %732 }
  0xa0   : > { %v638_v55 = vpop.permute.xlu0 %637 }
  0xfc   : > { %v2025_v41 = vpop.f32.mrb[0].mxu0 }
  0xfd   : > { %v2060_v42 = vpop.f32.mrb[0].mxu1  ;;  %v2026_v43 = vpop.f32.mrb[1].mxu0 }
  0xfe   : > { %v2027_v44 = vadd.f32 %v2026_v43, %v2025_v41  ;;  %v2061_v45 = vpop.f32.mrb[1].mxu1  ;;  %v977_v41 = vld [vmem:[%s3698_s3] sm:$0xff]  ;;  %v979_v43 = vld [vmem:[%s3698_s3 + $0x10] sm:$0xff] }
  0xff   : > { %v2062_v46 = vadd.f32 %v2061_v45, %v2060_v42  ;;  %v981_v42 = vld [vmem:[%s3698_s3 + $0x20] sm:$0xff]  ;;  %v986_v45 = vld [vmem:[%s3698_s3 + $0x48] sm:$0xff] }
 0x100   : > { %v2166_v49 = vpack.c.bf16 %v981_v42, %v977_v41 }
 0x101   : > { %v623_v47 = vadd.f32 %v2062_v46, %v2027_v44  ;;  %v983_v44 = vld [vmem:[%s3698_s3 + $0x30] sm:$0xff]  ;;  %v990_v46 = vld [vmem:[%s3698_s3 + $0x68] sm:$0xff] }
 0x102   : > { %v2294_v51 = vpack.c.bf16 %v983_v44, %v979_v43  ;;  %v1019_v43 = vld [vmem:[%s3698_s3 + $0x150] sm:$0xff] }
 0x103   : > { %2069 = vmatprep.subr.msk.mxu0 %vm647_vm1, %v623_v47  ;;  %v1023_v44 = vld [vmem:[%s3698_s3 + $0x170] sm:$0xff] }
 0x104   : > { %2070 = vmatpush3.msk.msra.mxu0 %vm647_vm1, %v623_v47  ;;  %v988_v47 = vld [vmem:[%s3698_s3 + $0x58] sm:$0xff] }
 0x105   : > { %2072 = vmatmul.mubr.msk.f32.vlgmr.msra.gmra.mrb[2].mxu0 %vm640_vm0, %v627_v48  ;;  %2149 = vmatprep.subr.bf16.mxu0 %v2148_v3  ;;  %v992_v48 = vld [vmem:[%s3698_s3 + $0x78] sm:$0xff] }
 0x106   : > { %899 = vmatprep.mubr.f32.mxu0 %v2481_v50  ;;  %2151 = vmatpush1.bf16.msra.mxu0 %v2150_v8  ;;  %v1006_v8 = vld [vmem:[%s3698_s3 + $0xe8] sm:$0xff] }
 0x107   : > { %2153 = vmatprep.subr.bf16.mxu0 %v2152_v17  ;;  %v2304_v17 = vpack.c.bf16 %v1008_v10, %v1004_v9  ;;  %v1048_v9 = vld [vmem:[%s3698_s3 + $0x238] sm:$0xff] }
 0x10a   : > { %2155 = vmatpush1.bf16.msra.mxu0 %v2154_v24  ;;  %v1016_v24 = vld [vmem:[%s3698_s3 + $0x138] sm:$0xff] }
 0x10b   : > { %2165 = vmatprep.subr.bf16.mxu0 %v2164_v29  ;;  %v2180_v29 = vpack.c.bf16 %v1014_v20, %v1010_v19  ;;  %v2308_v30 = vpack.c.bf16 %v1016_v24, %v1012_v21  ;;  %v1054_v19 = vld [vmem:[%s3698_s3 + $0x268] sm:$0xff]  ;;  %v1052_v20 = vld [vmem:[%s3698_s3 + $0x258] sm:$0xff] }
 0x10c   : > { %v1056_v21 = vld [vmem:[%s3698_s3 + $0x278] sm:$0xff] }
 0x1d8   : > { %v2073_v56 = vpop.f32.mrb[2].mxu0 }
 0x1d9   : > { %v723_v57 = vadd.f32 %v2073_v56, %v638_v55  ;;  %v717_v58 = vpop.f32.mrb[3].mxu0  ;;  %v2296_v55 = vpack.c.bf16 %v992_v48, %v988_v47  ;;  %v987_v56 = vld [vmem:[%s3698_s3 + $0x50] sm:$0xff]  ;;  %v1028_v47 = vld [vmem:[%s3698_s3 + $0x198] sm:$0xff] }
 0x1da   : > { %v718_v59 = vadd.f32 %v717_v58, %v633_v54  ;;  %v2168_v54 = vpack.c.bf16 %v990_v46, %v986_v45  ;;  %v994_v58 = vld [vmem:[%s3698_s3 + $0x88] sm:$0xff]  ;;  %v1032_v48 = vld [vmem:[%s3698_s3 + $0x1b8] sm:$0xff] }
 0x1db   : > { %v727_v60 = vmax.f32 %v723_v57, 0.0  ;;  %v991_v57 = vld [vmem:[%s3698_s3 + $0x70] sm:$0xff]  ;;  %v1026_v45 = vld [vmem:[%s3698_s3 + $0x188] sm:$0xff] }
 0x1dc   : > { %v726_v61 = vmax.f32 %v718_v59, 0.0  ;;  %v2298_v0 = vpack.c.bf16 %v991_v57, %v987_v56  ;;  %v1030_v46 = vld [vmem:[%s3698_s3 + $0x1a8] sm:$0xff]  ;;  %v1027_v56 = vld [vmem:[%s3698_s3 + $0x190] sm:$0xff] }
 0x1dd   : > { %v1031_v57 = vld [vmem:[%s3698_s3 + $0x1b0] sm:$0xff] }
 0x1de   : > { %v2146_v62 = vpack.c.bf16 %v727_v60, %v726_v61  ;;  %v998_v60 = vld [vmem:[%s3698_s3 + $0xa8] sm:$0xff]  ;;  %v996_v61 = vld [vmem:[%s3698_s3 + $0x98] sm:$0xff] }
 0x1df   : > { %v2172_v3 = vpack.c.bf16 %v998_v60, %v994_v58  ;;  %v1034_v58 = vld [vmem:[%s3698_s3 + $0x1c8] sm:$0xff]  ;;  %v1036_v60 = vld [vmem:[%s3698_s3 + $0x1d8] sm:$0xff] }
 0x1e0   : > { %2147 = vmatpush3.bf16.msra.mxu1 %v2146_v62  ;;  %v1000_v62 = vld [vmem:[%s3698_s3 + $0xb8] sm:$0xff] }
 0x1e1   : > { %2157 = vmatprep.subr.bf16.mxu1 %v2156_v7  ;;  %v2300_v4 = vpack.c.bf16 %v1000_v62, %v996_v61  ;;  %v1002_v7 = vld [vmem:[%s3698_s3 + $0xc8] sm:$0xff]  ;;  %v1040_v61 = vld [vmem:[%s3698_s3 + $0x1f8] sm:$0xff] }
 0x1e2   : > { %v2176_v15 = vpack.c.bf16 %v1006_v8, %v1002_v7  ;;  %v1046_v7 = vld [vmem:[%s3698_s3 + $0x228] sm:$0xff]  ;;  %v1044_v8 = vld [vmem:[%s3698_s3 + $0x218] sm:$0xff] }
 0x1e3   : > { %2079 = vmatmul.mubr.msk.f32.vlgmr.msra.gmra.mrb[2].mxu1 %vm735_vm3, %v728_v63  ;;  %v2170_v63 = vpack.c.bf16 %v989_v53, %v985_v52  ;;  %v1025_v52 = vld [vmem:[%s3698_s3 + $0x180] sm:$0xff] }
 0x1e4   : > { %970 = vmatprep.mubr.f32.mxu1 %v2481_v50  ;;  %2159 = vmatpush1.bf16.msra.mxu1 %v2158_v12  ;;  %v2302_v12 = vpack.c.bf16 %v999_v6, %v995_v5  ;;  %v1029_v53 = vld [vmem:[%s3698_s3 + $0x1a0] sm:$0xff]  ;;  %v1039_v5 = vld [vmem:[%s3698_s3 + $0x1f0] sm:$0xff]  ;;  %v1042_v6 = vld [vmem:[%s3698_s3 + $0x208] sm:$0xff] }
 0x1e5   : > { %2161 = vmatprep.subr.bf16.mxu1 %v2160_v18  ;;  %v1007_v18 = vld [vmem:[%s3698_s3 + $0xf0] sm:$0xff]  ;;  %v2190_v62 = vpack.c.bf16 %v1029_v53, %v1025_v52  ;;  %v2196_v14 = vpack.c.bf16 %v1046_v7, %v1042_v6  ;;  %v1069_v52 = vld [vmem:[%s3698_s3 + $0x2e0] sm:$0xff]  ;;  %v1086_v6 = vld [vmem:[%s3698_s3 + $0x368] sm:$0xff] }
 0x1e6   : > { %v1084_v7 = vld [vmem:[%s3698_s3 + $0x358] sm:$0xff] }
 0x1e8   : > { %2163 = vmatpush1.bf16.msra.mxu1 %v2162_v28  ;;  %v1013_v28 = vld [vmem:[%s3698_s3 + $0x120] sm:$0xff] }
 0x1e9   : > { %2293 = vmatprep.subr.bf16.mxu1 %v2292_v32  ;;  %v1015_v32 = vld [vmem:[%s3698_s3 + $0x130] sm:$0xff] }
 0x2b6   : > { %v805_v34 = vpop.f32.mrb[2].mxu1 }
 0x2b7   : > { %v806_v35 = vadd.f32 %v805_v34, %v733_v33  ;;  %v2080_v36 = vpop.f32.mrb[3].mxu1  ;;  %v1018_v33 = vld [vmem:[%s3698_s3 + $0x148] sm:$0xff] }
 0x2b8   : > { %v1022_v34 = vld [vmem:[%s3698_s3 + $0x168] sm:$0xff]  ;;  %v1024_v36 = vld [vmem:[%s3698_s3 + $0x178] sm:$0xff] }
 0x2b9   : > { %v809_v37 = vsub.f32 0.0, %v806_v35  ;;  %v1020_v35 = vld [vmem:[%s3698_s3 + $0x158] sm:$0xff]  ;;  %v2184_v41 = vpack.c.bf16 %v1022_v34, %v1018_v33  ;;  %v1062_v33 = vld [vmem:[%s3698_s3 + $0x2a8] sm:$0xff] }
 0x2ba   : > { %v2312_v42 = vpack.c.bf16 %v1024_v36, %v1020_v35  ;;  %v1060_v34 = vld [vmem:[%s3698_s3 + $0x298] sm:$0xff] }
 0x2bb   : > { %v810_v38 = vmul.f32 1.442695, %v809_v37  ;;  %v2182_v37 = vpack.c.bf16 %v1013_v28, %v1009_v27  ;;  %v1053_v27 = vld [vmem:[%s3698_s3 + $0x260] sm:$0xff]  ;;  %v1064_v35 = vld [vmem:[%s3698_s3 + $0x2b8] sm:$0xff] }
 0x2bd   : > { %2448 = vpow2.f32 %v810_v38  ;;  %v2310_v38 = vpack.c.bf16 %v1015_v32, %v1011_v31  ;;  %v1055_v31 = vld [vmem:[%s3698_s3 + $0x270] sm:$0xff]  ;;  %v1058_v32 = vld [vmem:[%s3698_s3 + $0x288] sm:$0xff] }
 0x2c7   : > { %v2449_v39 = vpop.eup %2448 }
 0x2c8   : > { %v812_v40 = vadd.f32 1.0, %v2449_v39  ;;  %v1017_v39 = vld [vmem:[%s3698_s3 + $0x140] sm:$0xff] }
 0x2ca   : > { %2450 = vrcp.f32 %v812_v40  ;;  %v1021_v40 = vld [vmem:[%s3698_s3 + $0x160] sm:$0xff] }
 0x2d4   : > { %v2451_v59 = vpop.eup %2450 }
 0x2d5   : > { %1977 = vmatmul.mubr.msk.f32.vlgmr.msra.gmra.mrb[4].mxu0 %vm831_vm4, %v2451_v59  ;;  %1978 = vmatmul.mubr.msk.f32.vlgmr.msra.gmra.mrb[4].mxu1 %vm831_vm4, %v2451_v59  ;;  %v1038_v59 = vld [vmem:[%s3698_s3 + $0x1e8] sm:$0xff] }
 0x2d6   : > { %2167 = vmatpush1.bf16.msra.mxu0 %v2166_v49  ;;  %2295 = vmatpush1.bf16.msra.mxu1 %v2294_v51  ;;  %v2186_v49 = vpack.c.bf16 %v1021_v40, %v1017_v39  ;;  %v2314_v51 = vpack.c.bf16 %v1023_v44, %v1019_v43  ;;  %v2192_v2 = vpack.c.bf16 %v1038_v59, %v1034_v58  ;;  %v1061_v39 = vld [vmem:[%s3698_s3 + $0x2a0] sm:$0xff]  ;;  %v1063_v43 = vld [vmem:[%s3698_s3 + $0x2b0] sm:$0xff]  ;;  %v1066_v44 = vld [vmem:[%s3698_s3 + $0x2c8] sm:$0xff] }
 0x2d7   : > { %2169 = vmatprep.subr.bf16.mxu0 %v2168_v54  ;;  %2297 = vmatprep.subr.bf16.mxu1 %v2296_v55  ;;  %v2188_v54 = vpack.c.bf16 %v1030_v46, %v1026_v45  ;;  %v2316_v55 = vpack.c.bf16 %v1032_v48, %v1028_v47  ;;  %v2204_v40 = vpack.c.bf16 %v1062_v33, %v1058_v32  ;;  %v1070_v45 = vld [vmem:[%s3698_s3 + $0x2e8] sm:$0xff]  ;;  %v1068_v46 = vld [vmem:[%s3698_s3 + $0x2d8] sm:$0xff] }
 0x2d8   : > { %1297 = vmatprep.mubr.f32.mxu0 %v2755_v22  ;;  %1439 = vmatprep.mubr.f32.mxu1 %v2755_v22  ;;  %v1003_v22 = vld [vmem:[%s3698_s3 + $0xd0] sm:$0xff]  ;;  %v1072_v47 = vld [vmem:[%s3698_s3 + $0x2f8] sm:$0xff]  ;;  %v2208_v53 = vpack.c.bf16 %v1070_v45, %v1066_v44  ;;  %v1078_v58 = vld [vmem:[%s3698_s3 + $0x328] sm:$0xff] }
 0x2d9   : > { %v2306_v26 = vpack.c.bf16 %v1007_v18, %v1003_v22  ;;  %v1047_v22 = vld [vmem:[%s3698_s3 + $0x230] sm:$0xff]  ;;  %v1050_v18 = vld [vmem:[%s3698_s3 + $0x248] sm:$0xff]  ;;  %v1076_v59 = vld [vmem:[%s3698_s3 + $0x318] sm:$0xff] }
 0x2da   : > { %2171 = vmatpush1.bf16.msra.mxu0 %v2170_v63  ;;  %2299 = vmatpush1.bf16.msra.mxu1 %v2298_v0  ;;  %v2318_v63 = vpack.c.bf16 %v1031_v57, %v1027_v56  ;;  %v1033_v0 = vld [vmem:[%s3698_s3 + $0x1c0] sm:$0xff]  ;;  %v2200_v28 = vpack.c.bf16 %v1054_v19, %v1050_v18  ;;  %v1071_v56 = vld [vmem:[%s3698_s3 + $0x2f0] sm:$0xff]  ;;  %v1074_v57 = vld [vmem:[%s3698_s3 + $0x308] sm:$0xff] }
 0x2db   : > { %2173 = vmatprep.subr.bf16.mxu0 %v2172_v3  ;;  %2301 = vmatprep.subr.bf16.mxu1 %v2300_v4  ;;  %v2320_v3 = vpack.c.bf16 %v1040_v61, %v1036_v60  ;;  %v1035_v4 = vld [vmem:[%s3698_s3 + $0x1d0] sm:$0xff]  ;;  %v2194_v10 = vpack.c.bf16 %v1037_v1, %v1033_v0  ;;  %v1080_v60 = vld [vmem:[%s3698_s3 + $0x338] sm:$0xff]  ;;  %v1077_v0 = vld [vmem:[%s3698_s3 + $0x320] sm:$0xff]  ;;  %v2212_v1 = vpack.c.bf16 %v1078_v58, %v1074_v57 }
 0x2dc   : > { %v1094_v18 = vld [vmem:[%s3698_s3 + $0x3a8] sm:$0xff]  ;;  %v1092_v19 = vld [vmem:[%s3698_s3 + $0x398] sm:$0xff] }
 0x2dd   : > { %v1102_v32 = vld [vmem:[%s3698_s3 + $0x3e8] sm:$0xff]  ;;  %v1100_v33 = vld [vmem:[%s3698_s3 + $0x3d8] sm:$0xff] }
 0x2de   : > { %2175 = vmatpush1.bf16.msra.mxu0 %v2174_v11  ;;  %2303 = vmatpush1.bf16.msra.mxu1 %v2302_v12  ;;  %v2322_v11 = vpack.c.bf16 %v1039_v5, %v1035_v4  ;;  %v1041_v12 = vld [vmem:[%s3698_s3 + $0x200] sm:$0xff]  ;;  %v1079_v4 = vld [vmem:[%s3698_s3 + $0x330] sm:$0xff]  ;;  %v1082_v5 = vld [vmem:[%s3698_s3 + $0x348] sm:$0xff] }
 0x2df   : > { %2177 = vmatprep.subr.bf16.mxu0 %v2176_v15  ;;  %2305 = vmatprep.subr.bf16.mxu1 %v2304_v17  ;;  %v2324_v15 = vpack.c.bf16 %v1048_v9, %v1044_v8  ;;  %v1043_v17 = vld [vmem:[%s3698_s3 + $0x210] sm:$0xff]  ;;  %v2198_v24 = vpack.c.bf16 %v1045_v13, %v1041_v12  ;;  %v1088_v8 = vld [vmem:[%s3698_s3 + $0x378] sm:$0xff]  ;;  %v1085_v12 = vld [vmem:[%s3698_s3 + $0x360] sm:$0xff]  ;;  %v2216_v13 = vpack.c.bf16 %v1086_v6, %v1082_v5 }
 0x2e0   : > { %v1110_v44 = vld [vmem:[%s3698_s3 + $0x428] sm:$0xff]  ;;  %v1108_v45 = vld [vmem:[%s3698_s3 + $0x418] sm:$0xff] }
 0x2e1   : > { %v1118_v57 = vld [vmem:[%s3698_s3 + $0x468] sm:$0xff]  ;;  %v1116_v58 = vld [vmem:[%s3698_s3 + $0x458] sm:$0xff] }
 0x2e2   : > { %2179 = vmatpush1.bf16.msra.mxu0 %v2178_v25  ;;  %2307 = vmatpush1.bf16.msra.mxu1 %v2306_v26  ;;  %v2326_v25 = vpack.c.bf16 %v1047_v22, %v1043_v17  ;;  %v1049_v26 = vld [vmem:[%s3698_s3 + $0x240] sm:$0xff]  ;;  %v1087_v17 = vld [vmem:[%s3698_s3 + $0x370] sm:$0xff]  ;;  %v1090_v22 = vld [vmem:[%s3698_s3 + $0x388] sm:$0xff] }
 0x2e3   : > { %2181 = vmatprep.subr.bf16.mxu0 %v2180_v29  ;;  %2309 = vmatprep.subr.bf16.mxu1 %v2308_v30  ;;  %v2328_v29 = vpack.c.bf16 %v1056_v21, %v1052_v20  ;;  %v1051_v30 = vld [vmem:[%s3698_s3 + $0x250] sm:$0xff]  ;;  %v2202_v36 = vpack.c.bf16 %v1053_v27, %v1049_v26  ;;  %v1096_v20 = vld [vmem:[%s3698_s3 + $0x3b8] sm:$0xff]  ;;  %v1093_v26 = vld [vmem:[%s3698_s3 + $0x3a0] sm:$0xff]  ;;  %v2220_v27 = vpack.c.bf16 %v1094_v18, %v1090_v22 }
 0x2e4   : > { %v1126_v5 = vld [vmem:[%s3698_s3 + $0x4a8] sm:$0xff]  ;;  %v1124_v6 = vld [vmem:[%s3698_s3 + $0x498] sm:$0xff] }
 0x2e5   : > { %v1132_v22 = vld [vmem:[%s3698_s3 + $0x4d8] sm:$0xff] }
 0x2e6   : > { %2183 = vmatpush1.bf16.msra.mxu0 %v2182_v37  ;;  %2311 = vmatpush1.bf16.msra.mxu1 %v2310_v38  ;;  %v2330_v37 = vpack.c.bf16 %v1055_v31, %v1051_v30  ;;  %v1057_v38 = vld [vmem:[%s3698_s3 + $0x280] sm:$0xff]  ;;  %v1095_v30 = vld [vmem:[%s3698_s3 + $0x3b0] sm:$0xff]  ;;  %v1098_v31 = vld [vmem:[%s3698_s3 + $0x3c8] sm:$0xff] }
 0x2e7   : > { %2185 = vmatprep.subr.bf16.mxu0 %v2184_v41  ;;  %2313 = vmatprep.subr.bf16.mxu1 %v2312_v42  ;;  %v2332_v41 = vpack.c.bf16 %v1064_v35, %v1060_v34  ;;  %v1059_v42 = vld [vmem:[%s3698_s3 + $0x290] sm:$0xff]  ;;  %v2206_v48 = vpack.c.bf16 %v1061_v39, %v1057_v38  ;;  %v1104_v34 = vld [vmem:[%s3698_s3 + $0x3f8] sm:$0xff]  ;;  %v1101_v38 = vld [vmem:[%s3698_s3 + $0x3e0] sm:$0xff]  ;;  %v2224_v39 = vpack.c.bf16 %v1102_v32, %v1098_v31 }
 0x2e8   : > { %v1136_v18 = vld [vmem:[%s3698_s3 + $0x4f8] sm:$0xff] }
 0x2e9   : > { %v1144_v31 = vld [vmem:[%s3698_s3 + $0x538] sm:$0xff] }
 0x2ea   : > { %2187 = vmatpush1.bf16.msra.mxu0 %v2186_v49  ;;  %2315 = vmatpush1.bf16.msra.mxu1 %v2314_v51  ;;  %v2334_v49 = vpack.c.bf16 %v1063_v43, %v1059_v42  ;;  %v1065_v51 = vld [vmem:[%s3698_s3 + $0x2c0] sm:$0xff]  ;;  %v1103_v42 = vld [vmem:[%s3698_s3 + $0x3f0] sm:$0xff]  ;;  %v1106_v43 = vld [vmem:[%s3698_s3 + $0x408] sm:$0xff] }
 0x2eb   : > { %2189 = vmatprep.subr.bf16.mxu0 %v2188_v54  ;;  %2317 = vmatprep.subr.bf16.mxu1 %v2316_v55  ;;  %v2336_v54 = vpack.c.bf16 %v1072_v47, %v1068_v46  ;;  %v1067_v55 = vld [vmem:[%s3698_s3 + $0x2d0] sm:$0xff]  ;;  %v2210_v61 = vpack.c.bf16 %v1069_v52, %v1065_v51  ;;  %v1112_v46 = vld [vmem:[%s3698_s3 + $0x438] sm:$0xff]  ;;  %v1109_v51 = vld [vmem:[%s3698_s3 + $0x420] sm:$0xff]  ;;  %v2228_v52 = vpack.c.bf16 %v1110_v44, %v1106_v43 }
 0x2ec   : > { %v1152_v43 = vld [vmem:[%s3698_s3 + $0x578] sm:$0xff] }
 0x2ee   : > { %2191 = vmatpush1.bf16.msra.mxu0 %v2190_v62  ;;  %2319 = vmatpush1.bf16.msra.mxu1 %v2318_v63  ;;  %v2338_v62 = vpack.c.bf16 %v1071_v56, %v1067_v55  ;;  %v1073_v63 = vld [vmem:[%s3698_s3 + $0x300] sm:$0xff]  ;;  %v1111_v55 = vld [vmem:[%s3698_s3 + $0x430] sm:$0xff]  ;;  %v1114_v56 = vld [vmem:[%s3698_s3 + $0x448] sm:$0xff] }
 0x2ef   : > { %2193 = vmatprep.subr.bf16.mxu0 %v2192_v2  ;;  %2321 = vmatprep.subr.bf16.mxu1 %v2320_v3  ;;  %v2340_v2 = vpack.c.bf16 %v1080_v60, %v1076_v59  ;;  %v1075_v3 = vld [vmem:[%s3698_s3 + $0x310] sm:$0xff]  ;;  %v2214_v9 = vpack.c.bf16 %v1077_v0, %v1073_v63  ;;  %v1120_v59 = vld [vmem:[%s3698_s3 + $0x478] sm:$0xff]  ;;  %v1117_v63 = vld [vmem:[%s3698_s3 + $0x460] sm:$0xff]  ;;  %v2232_v0 = vpack.c.bf16 %v1118_v57, %v1114_v56 }
 0x2f0   : > { %v1160_v56 = vld [vmem:[%s3698_s3 + $0x5b8] sm:$0xff] }
 0x2f2   : > { %2195 = vmatpush1.bf16.msra.mxu0 %v2194_v10  ;;  %2323 = vmatpush1.bf16.msra.mxu1 %v2322_v11  ;;  %v2342_v10 = vpack.c.bf16 %v1079_v4, %v1075_v3  ;;  %v1081_v11 = vld [vmem:[%s3698_s3 + $0x340] sm:$0xff]  ;;  %v1119_v3 = vld [vmem:[%s3698_s3 + $0x470] sm:$0xff]  ;;  %v1122_v4 = vld [vmem:[%s3698_s3 + $0x488] sm:$0xff] }
 0x2f3   : > { %2197 = vmatprep.subr.bf16.mxu0 %v2196_v14  ;;  %2325 = vmatprep.subr.bf16.mxu1 %v2324_v15  ;;  %v2344_v14 = vpack.c.bf16 %v1088_v8, %v1084_v7  ;;  %v1083_v15 = vld [vmem:[%s3698_s3 + $0x350] sm:$0xff]  ;;  %v2218_v21 = vpack.c.bf16 %v1085_v12, %v1081_v11  ;;  %v1128_v7 = vld [vmem:[%s3698_s3 + $0x4b8] sm:$0xff]  ;;  %v1125_v11 = vld [vmem:[%s3698_s3 + $0x4a0] sm:$0xff]  ;;  %v2236_v12 = vpack.c.bf16 %v1126_v5, %v1122_v4 }
 0x2f4   : > { %v1168_v4 = vld [vmem:[%s3698_s3 + $0x5f8] sm:$0xff] }
 0x2f6   : > { %2199 = vmatpush1.bf16.msra.mxu0 %v2198_v24  ;;  %2327 = vmatpush1.bf16.msra.mxu1 %v2326_v25  ;;  %v2346_v24 = vpack.c.bf16 %v1087_v17, %v1083_v15  ;;  %v1089_v25 = vld [vmem:[%s3698_s3 + $0x380] sm:$0xff]  ;;  %v1130_v15 = vld [vmem:[%s3698_s3 + $0x4c8] sm:$0xff] }
 0x2f7   : > { %2201 = vmatprep.subr.bf16.mxu0 %v2200_v28  ;;  %2329 = vmatprep.subr.bf16.mxu1 %v2328_v29  ;;  %v2348_v28 = vpack.c.bf16 %v1096_v20, %v1092_v19  ;;  %v1091_v29 = vld [vmem:[%s3698_s3 + $0x390] sm:$0xff]  ;;  %v2222_v35 = vpack.c.bf16 %v1093_v26, %v1089_v25  ;;  %v1134_v17 = vld [vmem:[%s3698_s3 + $0x4e8] sm:$0xff]  ;;  %v2368_v26 = vpack.c.bf16 %v1136_v18, %v1132_v22  ;;  %v1169_v18 = vld [vmem:[%s3698_s3 + $0x600] sm:$0xff] }
 0x2f8   : > { %v2240_v25 = vpack.c.bf16 %v1134_v17, %v1130_v15  ;;  %v1176_v15 = vld [vmem:[%s3698_s3 + $0x638] sm:$0xff] }
 0x2fa   : > { %2203 = vmatpush1.bf16.msra.mxu0 %v2202_v36  ;;  %2331 = vmatpush1.bf16.msra.mxu1 %v2330_v37  ;;  %v2350_v36 = vpack.c.bf16 %v1095_v30, %v1091_v29  ;;  %v1097_v37 = vld [vmem:[%s3698_s3 + $0x3c0] sm:$0xff]  ;;  %v1142_v29 = vld [vmem:[%s3698_s3 + $0x528] sm:$0xff]  ;;  %v1140_v30 = vld [vmem:[%s3698_s3 + $0x518] sm:$0xff] }
 0x2fb   : > { %2205 = vmatprep.subr.bf16.mxu0 %v2204_v40  ;;  %2333 = vmatprep.subr.bf16.mxu1 %v2332_v41  ;;  %v2352_v40 = vpack.c.bf16 %v1104_v34, %v1100_v33  ;;  %v1099_v41 = vld [vmem:[%s3698_s3 + $0x3d0] sm:$0xff]  ;;  %v2226_v47 = vpack.c.bf16 %v1101_v38, %v1097_v37  ;;  %v1137_v34 = vld [vmem:[%s3698_s3 + $0x500] sm:$0xff]  ;;  %v2372_v37 = vpack.c.bf16 %v1144_v31, %v1140_v30 }
 0x2fc   : > { %v1139_v38 = vld [vmem:[%s3698_s3 + $0x510] sm:$0xff]  ;;  %v1177_v31 = vld [vmem:[%s3698_s3 + $0x640] sm:$0xff] }
 0x2fe   : > { %2207 = vmatpush1.bf16.msra.mxu0 %v2206_v48  ;;  %2335 = vmatpush1.bf16.msra.mxu1 %v2334_v49  ;;  %v2354_v48 = vpack.c.bf16 %v1103_v42, %v1099_v41  ;;  %v1105_v49 = vld [vmem:[%s3698_s3 + $0x400] sm:$0xff]  ;;  %v1150_v41 = vld [vmem:[%s3698_s3 + $0x568] sm:$0xff]  ;;  %v1148_v42 = vld [vmem:[%s3698_s3 + $0x558] sm:$0xff] }
 0x2ff   : > { %2209 = vmatprep.subr.bf16.mxu0 %v2208_v53  ;;  %2337 = vmatprep.subr.bf16.mxu1 %v2336_v54  ;;  %v2356_v53 = vpack.c.bf16 %v1112_v46, %v1108_v45  ;;  %v1107_v54 = vld [vmem:[%s3698_s3 + $0x410] sm:$0xff]  ;;  %v2230_v60 = vpack.c.bf16 %v1109_v51, %v1105_v49  ;;  %v1145_v46 = vld [vmem:[%s3698_s3 + $0x540] sm:$0xff]  ;;  %v2376_v49 = vpack.c.bf16 %v1152_v43, %v1148_v42 }
 0x300   : > { %v1147_v51 = vld [vmem:[%s3698_s3 + $0x550] sm:$0xff]  ;;  %v1185_v43 = vld [vmem:[%s3698_s3 + $0x680] sm:$0xff] }
 0x302   : > { %2211 = vmatpush1.bf16.msra.mxu0 %v2210_v61  ;;  %2339 = vmatpush1.bf16.msra.mxu1 %v2338_v62  ;;  %v2358_v61 = vpack.c.bf16 %v1111_v55, %v1107_v54  ;;  %v1113_v62 = vld [vmem:[%s3698_s3 + $0x440] sm:$0xff]  ;;  %v1158_v54 = vld [vmem:[%s3698_s3 + $0x5a8] sm:$0xff]  ;;  %v1156_v55 = vld [vmem:[%s3698_s3 + $0x598] sm:$0xff] }
 0x303   : > { %2213 = vmatprep.subr.bf16.mxu0 %v2212_v1  ;;  %2341 = vmatprep.subr.bf16.mxu1 %v2340_v2  ;;  %v2360_v1 = vpack.c.bf16 %v1120_v59, %v1116_v58  ;;  %v1115_v2 = vld [vmem:[%s3698_s3 + $0x450] sm:$0xff]  ;;  %v2234_v8 = vpack.c.bf16 %v1117_v63, %v1113_v62  ;;  %v1153_v59 = vld [vmem:[%s3698_s3 + $0x580] sm:$0xff]  ;;  %v2380_v62 = vpack.c.bf16 %v1160_v56, %v1156_v55 }
 0x304   : > { %v1155_v63 = vld [vmem:[%s3698_s3 + $0x590] sm:$0xff]  ;;  %v1193_v56 = vld [vmem:[%s3698_s3 + $0x6c0] sm:$0xff] }
 0x306   : > { %2215 = vmatpush1.bf16.msra.mxu0 %v2214_v9  ;;  %2343 = vmatpush1.bf16.msra.mxu1 %v2342_v10  ;;  %v2362_v9 = vpack.c.bf16 %v1119_v3, %v1115_v2  ;;  %v1121_v10 = vld [vmem:[%s3698_s3 + $0x480] sm:$0xff]  ;;  %v1166_v2 = vld [vmem:[%s3698_s3 + $0x5e8] sm:$0xff]  ;;  %v1164_v3 = vld [vmem:[%s3698_s3 + $0x5d8] sm:$0xff] }
 0x307   : > { %2217 = vmatprep.subr.bf16.mxu0 %v2216_v13  ;;  %2345 = vmatprep.subr.bf16.mxu1 %v2344_v14  ;;  %v2364_v13 = vpack.c.bf16 %v1128_v7, %v1124_v6  ;;  %v1127_v14 = vld [vmem:[%s3698_s3 + $0x4b0] sm:$0xff]  ;;  %v2238_v19 = vpack.c.bf16 %v1125_v11, %v1121_v10  ;;  %v1161_v7 = vld [vmem:[%s3698_s3 + $0x5c0] sm:$0xff]  ;;  %v2384_v10 = vpack.c.bf16 %v1168_v4, %v1164_v3 }
 0x308   : > { %v1163_v11 = vld [vmem:[%s3698_s3 + $0x5d0] sm:$0xff]  ;;  %v1201_v4 = vld [vmem:[%s3698_s3 + $0x700] sm:$0xff] }
 0x30a   : > { %2219 = vmatpush1.bf16.msra.mxu0 %v2218_v21  ;;  %2347 = vmatpush1.bf16.msra.mxu1 %v2346_v24  ;;  %v1129_v21 = vld [vmem:[%s3698_s3 + $0x4c0] sm:$0xff] }
 0x30b   : > { %2221 = vmatprep.subr.bf16.mxu0 %v2220_v27  ;;  %2349 = vmatprep.subr.bf16.mxu1 %v2348_v28  ;;  %v1133_v24 = vld [vmem:[%s3698_s3 + $0x4e0] sm:$0xff]  ;;  %v1135_v27 = vld [vmem:[%s3698_s3 + $0x4f0] sm:$0xff]  ;;  %v1138_v28 = vld [vmem:[%s3698_s3 + $0x508] sm:$0xff] }
 0x30c   : > { %v2242_v32 = vpack.c.bf16 %v1133_v24, %v1129_v21  ;;  %v1171_v24 = vld [vmem:[%s3698_s3 + $0x610] sm:$0xff] }
 0x30e   : > { %2223 = vmatpush1.bf16.msra.mxu0 %v2222_v35  ;;  %2351 = vmatpush1.bf16.msra.mxu1 %v2350_v36  ;;  %v1141_v35 = vld [vmem:[%s3698_s3 + $0x520] sm:$0xff]  ;;  %v2244_v36 = vpack.c.bf16 %v1142_v29, %v1138_v28  ;;  %v1184_v28 = vld [vmem:[%s3698_s3 + $0x678] sm:$0xff] }
 0x30f   : > { %2225 = vmatprep.subr.bf16.mxu0 %v2224_v39  ;;  %2353 = vmatprep.subr.bf16.mxu1 %v2352_v40  ;;  %v1143_v39 = vld [vmem:[%s3698_s3 + $0x530] sm:$0xff]  ;;  %v1146_v40 = vld [vmem:[%s3698_s3 + $0x548] sm:$0xff]  ;;  %v2246_v44 = vpack.c.bf16 %v1141_v35, %v1137_v34 }
 0x310   : > { %v2374_v45 = vpack.c.bf16 %v1143_v39, %v1139_v38  ;;  %v1179_v35 = vld [vmem:[%s3698_s3 + $0x650] sm:$0xff]  ;;  %v1190_v38 = vld [vmem:[%s3698_s3 + $0x6a8] sm:$0xff]  ;;  %v1188_v39 = vld [vmem:[%s3698_s3 + $0x698] sm:$0xff] }
 0x312   : > { %2227 = vmatpush1.bf16.msra.mxu0 %v2226_v47  ;;  %2355 = vmatpush1.bf16.msra.mxu1 %v2354_v48  ;;  %v1149_v47 = vld [vmem:[%s3698_s3 + $0x560] sm:$0xff]  ;;  %v2248_v48 = vpack.c.bf16 %v1150_v41, %v1146_v40  ;;  %v1192_v40 = vld [vmem:[%s3698_s3 + $0x6b8] sm:$0xff] }
 0x313   : > { %2229 = vmatprep.subr.bf16.mxu0 %v2228_v52  ;;  %2357 = vmatprep.subr.bf16.mxu1 %v2356_v53  ;;  %v1151_v52 = vld [vmem:[%s3698_s3 + $0x570] sm:$0xff]  ;;  %v1154_v53 = vld [vmem:[%s3698_s3 + $0x588] sm:$0xff]  ;;  %v2250_v57 = vpack.c.bf16 %v1149_v47, %v1145_v46  ;;  %v2396_v46 = vpack.c.bf16 %v1192_v40, %v1188_v39  ;;  %v1225_v40 = vld [vmem:[%s3698_s3 + $0x7c0] sm:$0xff] }
 0x314   : > { %v2378_v58 = vpack.c.bf16 %v1151_v52, %v1147_v51  ;;  %v1187_v47 = vld [vmem:[%s3698_s3 + $0x690] sm:$0xff]  ;;  %v1198_v51 = vld [vmem:[%s3698_s3 + $0x6e8] sm:$0xff]  ;;  %v1196_v52 = vld [vmem:[%s3698_s3 + $0x6d8] sm:$0xff] }
 0x315   : > { %1298 = vmatmul.mubr.f32.vlgmr.msra.gmra.mrb[6].mxu0 %v2741_v16  ;;  %1440 = vmatmul.mubr.f32.vlgmr.msra.gmra.mrb[6].mxu1 %v2741_v16  ;;  %v1123_v16 = vld [vmem:[%s3698_s3 + $0x490] sm:$0xff] }
 0x316   : > { %2231 = vmatpush1.bf16.msra.mxu0 %v2230_v60  ;;  %2359 = vmatpush1.bf16.msra.mxu1 %v2358_v61  ;;  %v2366_v20 = vpack.c.bf16 %v1127_v14, %v1123_v16  ;;  %v1157_v60 = vld [vmem:[%s3698_s3 + $0x5a0] sm:$0xff]  ;;  %v2252_v61 = vpack.c.bf16 %v1158_v54, %v1154_v53  ;;  %v1174_v16 = vld [vmem:[%s3698_s3 + $0x628] sm:$0xff]  ;;  %v1172_v14 = vld [vmem:[%s3698_s3 + $0x618] sm:$0xff] }
 0x317   : > { %2233 = vmatprep.subr.bf16.mxu0 %v2232_v0  ;;  %2361 = vmatprep.subr.bf16.mxu1 %v2360_v1  ;;  %v1159_v0 = vld [vmem:[%s3698_s3 + $0x5b0] sm:$0xff]  ;;  %v1162_v1 = vld [vmem:[%s3698_s3 + $0x5c8] sm:$0xff]  ;;  %v2254_v5 = vpack.c.bf16 %v1157_v60, %v1153_v59  ;;  %v2388_v21 = vpack.c.bf16 %v1176_v15, %v1172_v14  ;;  %v1200_v53 = vld [vmem:[%s3698_s3 + $0x6f8] sm:$0xff] }
 0x318   : > { %1368 = vmatprep.mubr.f32.mxu0 %v2757_v23  ;;  %1510 = vmatprep.mubr.f32.mxu1 %v2757_v23  ;;  %v1131_v23 = vld [vmem:[%s3698_s3 + $0x4d0] sm:$0xff]  ;;  %v2382_v6 = vpack.c.bf16 %v1159_v0, %v1155_v63  ;;  %v2400_v59 = vpack.c.bf16 %v1200_v53, %v1196_v52  ;;  %v1206_v63 = vld [vmem:[%s3698_s3 + $0x728] sm:$0xff]  ;;  %v1204_v0 = vld [vmem:[%s3698_s3 + $0x718] sm:$0xff] }
 0x319   : > { %v2370_v33 = vpack.c.bf16 %v1135_v27, %v1131_v23  ;;  %v1182_v23 = vld [vmem:[%s3698_s3 + $0x668] sm:$0xff]  ;;  %v1180_v27 = vld [vmem:[%s3698_s3 + $0x658] sm:$0xff]  ;;  %v1195_v60 = vld [vmem:[%s3698_s3 + $0x6d0] sm:$0xff] }
 0x31a   : > { %2235 = vmatpush1.bf16.msra.mxu0 %v2234_v8  ;;  %2363 = vmatpush1.bf16.msra.mxu1 %v2362_v9  ;;  %v1165_v8 = vld [vmem:[%s3698_s3 + $0x5e0] sm:$0xff]  ;;  %v2256_v9 = vpack.c.bf16 %v1166_v2, %v1162_v1  ;;  %v2392_v34 = vpack.c.bf16 %v1184_v28, %v1180_v27  ;;  %v1208_v1 = vld [vmem:[%s3698_s3 + $0x738] sm:$0xff] }
 0x31b   : > { %2237 = vmatprep.subr.bf16.mxu0 %v2236_v12  ;;  %2365 = vmatprep.subr.bf16.mxu1 %v2364_v13  ;;  %v1167_v12 = vld [vmem:[%s3698_s3 + $0x5f0] sm:$0xff]  ;;  %v1170_v13 = vld [vmem:[%s3698_s3 + $0x608] sm:$0xff]  ;;  %v2258_v17 = vpack.c.bf16 %v1165_v8, %v1161_v7  ;;  %v2404_v7 = vpack.c.bf16 %v1208_v1, %v1204_v0  ;;  %v1209_v15 = vld [vmem:[%s3698_s3 + $0x740] sm:$0xff] }
 0x31c   : > { %v2386_v22 = vpack.c.bf16 %v1167_v12, %v1163_v11  ;;  %v1203_v8 = vld [vmem:[%s3698_s3 + $0x710] sm:$0xff]  ;;  %v1214_v11 = vld [vmem:[%s3698_s3 + $0x768] sm:$0xff]  ;;  %v1212_v12 = vld [vmem:[%s3698_s3 + $0x758] sm:$0xff] }
 0x31d   : > { %v1217_v28 = vld [vmem:[%s3698_s3 + $0x780] sm:$0xff] }
 0x31e   : > { %2239 = vmatpush1.bf16.msra.mxu0 %v2238_v19  ;;  %2367 = vmatpush1.bf16.msra.mxu1 %v2366_v20  ;;  %v1173_v19 = vld [vmem:[%s3698_s3 + $0x620] sm:$0xff]  ;;  %v2260_v20 = vpack.c.bf16 %v1174_v16, %v1170_v13  ;;  %v1216_v13 = vld [vmem:[%s3698_s3 + $0x778] sm:$0xff] }
 0x31f   : > { %2241 = vmatprep.subr.bf16.mxu0 %v2240_v25  ;;  %2369 = vmatprep.subr.bf16.mxu1 %v2368_v26  ;;  %v1175_v25 = vld [vmem:[%s3698_s3 + $0x630] sm:$0xff]  ;;  %v1178_v26 = vld [vmem:[%s3698_s3 + $0x648] sm:$0xff]  ;;  %v2262_v29 = vpack.c.bf16 %v1173_v19, %v1169_v18  ;;  %v2408_v18 = vpack.c.bf16 %v1216_v13, %v1212_v12 }
 0x320   : > { %v2390_v30 = vpack.c.bf16 %v1175_v25, %v1171_v24  ;;  %v1211_v19 = vld [vmem:[%s3698_s3 + $0x750] sm:$0xff]  ;;  %v1222_v24 = vld [vmem:[%s3698_s3 + $0x7a8] sm:$0xff]  ;;  %v1220_v25 = vld [vmem:[%s3698_s3 + $0x798] sm:$0xff] }
 0x322   : > { %2243 = vmatpush1.bf16.msra.mxu0 %v2242_v32  ;;  %2371 = vmatpush1.bf16.msra.mxu1 %v2370_v33  ;;  %v1181_v32 = vld [vmem:[%s3698_s3 + $0x660] sm:$0xff]  ;;  %v2264_v33 = vpack.c.bf16 %v1182_v23, %v1178_v26  ;;  %v1224_v26 = vld [vmem:[%s3698_s3 + $0x7b8] sm:$0xff] }
 0x323   : > { %2245 = vmatprep.subr.bf16.mxu0 %v2244_v36  ;;  %2373 = vmatprep.subr.bf16.mxu1 %v2372_v37  ;;  %v1183_v36 = vld [vmem:[%s3698_s3 + $0x670] sm:$0xff]  ;;  %v1186_v37 = vld [vmem:[%s3698_s3 + $0x688] sm:$0xff]  ;;  %v2266_v41 = vpack.c.bf16 %v1181_v32, %v1177_v31  ;;  %v2412_v31 = vpack.c.bf16 %v1224_v26, %v1220_v25 }
 0x324   : > { %v2394_v42 = vpack.c.bf16 %v1183_v36, %v1179_v35  ;;  %v1219_v32 = vld [vmem:[%s3698_s3 + $0x790] sm:$0xff]  ;;  %v1230_v35 = vld [vmem:[%s3698_s3 + $0x7e8] sm:$0xff]  ;;  %v1228_v36 = vld [vmem:[%s3698_s3 + $0x7d8] sm:$0xff] }
 0x326   : > { %2247 = vmatpush1.bf16.msra.mxu0 %v2246_v44  ;;  %2375 = vmatpush1.bf16.msra.mxu1 %v2374_v45  ;;  %v1189_v44 = vld [vmem:[%s3698_s3 + $0x6a0] sm:$0xff]  ;;  %v2268_v45 = vpack.c.bf16 %v1190_v38, %v1186_v37  ;;  %v1232_v37 = vld [vmem:[%s3698_s3 + $0x7f8] sm:$0xff] }
 0x327   : > { %2249 = vmatprep.subr.bf16.mxu0 %v2248_v48  ;;  %2377 = vmatprep.subr.bf16.mxu1 %v2376_v49  ;;  %v1191_v48 = vld [vmem:[%s3698_s3 + $0x6b0] sm:$0xff]  ;;  %v1194_v49 = vld [vmem:[%s3698_s3 + $0x6c8] sm:$0xff]  ;;  %v2270_v54 = vpack.c.bf16 %v1189_v44, %v1185_v43  ;;  %v1229_v43 = vld [vmem:[%s3698_s3 + $0x7e0] sm:$0xff] }
 0x328   : > { %v2398_v55 = vpack.c.bf16 %v1191_v48, %v1187_v47  ;;  %v1227_v44 = vld [vmem:[%s3698_s3 + $0x7d0] sm:$0xff]  ;;  %v3638_v48 = vld [vmem:[%s2723_s14 + $0x8] sm:$0xff] }
 0x32a   : > { %2251 = vmatpush1.bf16.msra.mxu0 %v2250_v57  ;;  %2379 = vmatpush1.bf16.msra.mxu1 %v2378_v58  ;;  %v1197_v57 = vld [vmem:[%s3698_s3 + $0x6e0] sm:$0xff]  ;;  %v2272_v58 = vpack.c.bf16 %v1198_v51, %v1194_v49 }
 0x32b   : > { %2253 = vmatprep.subr.bf16.mxu0 %v2252_v61  ;;  %2381 = vmatprep.subr.bf16.mxu1 %v2380_v62  ;;  %v1199_v61 = vld [vmem:[%s3698_s3 + $0x6f0] sm:$0xff]  ;;  %v1202_v62 = vld [vmem:[%s3698_s3 + $0x708] sm:$0xff]  ;;  %v2274_v2 = vpack.c.bf16 %v1197_v57, %v1193_v56 }
 0x32c   : > { %v2402_v3 = vpack.c.bf16 %v1199_v61, %v1195_v60  ;;  %v1517_v60 = vld [vmem:[%s3703_s8] sm:$0xff]  ;;  %v1518_v61 = vld [vmem:[%s3703_s8 + $0x8] sm:$0xff] }
 0x32e   : > { %2255 = vmatpush1.bf16.msra.mxu0 %v2254_v5  ;;  %2383 = vmatpush1.bf16.msra.mxu1 %v2382_v6  ;;  %v1205_v5 = vld [vmem:[%s3698_s3 + $0x720] sm:$0xff]  ;;  %v2276_v6 = vpack.c.bf16 %v1206_v63, %v1202_v62 }
 0x32f   : > { %2257 = vmatprep.subr.bf16.mxu0 %v2256_v9  ;;  %2385 = vmatprep.subr.bf16.mxu1 %v2384_v10  ;;  %v1207_v9 = vld [vmem:[%s3698_s3 + $0x730] sm:$0xff]  ;;  %v1210_v10 = vld [vmem:[%s3698_s3 + $0x748] sm:$0xff]  ;;  %v2278_v16 = vpack.c.bf16 %v1205_v5, %v1201_v4 }
 0x330   : > { %v2406_v14 = vpack.c.bf16 %v1207_v9, %v1203_v8 }
 0x332   : > { %2259 = vmatpush1.bf16.msra.mxu0 %v2258_v17  ;;  %2387 = vmatpush1.bf16.msra.mxu1 %v2386_v22  ;;  %v1213_v17 = vld [vmem:[%s3698_s3 + $0x760] sm:$0xff]  ;;  %v2280_v22 = vpack.c.bf16 %v1214_v11, %v1210_v10 }
 0x333   : > { %2261 = vmatprep.subr.bf16.mxu0 %v2260_v20  ;;  %2389 = vmatprep.subr.bf16.mxu1 %v2388_v21  ;;  %v1215_v20 = vld [vmem:[%s3698_s3 + $0x770] sm:$0xff]  ;;  %v1218_v21 = vld [vmem:[%s3698_s3 + $0x788] sm:$0xff]  ;;  %v2282_v23 = vpack.c.bf16 %v1213_v17, %v1209_v15 }
 0x334   : > { %v2410_v27 = vpack.c.bf16 %v1215_v20, %v1211_v19 }
 0x336   : > { %2263 = vmatpush1.bf16.msra.mxu0 %v2262_v29  ;;  %2391 = vmatpush1.bf16.msra.mxu1 %v2390_v30  ;;  %v1221_v29 = vld [vmem:[%s3698_s3 + $0x7a0] sm:$0xff]  ;;  %v2284_v30 = vpack.c.bf16 %v1222_v24, %v1218_v21 }
 0x337   : > { %2265 = vmatprep.subr.bf16.mxu0 %v2264_v33  ;;  %2393 = vmatprep.subr.bf16.mxu1 %v2392_v34  ;;  %v1223_v33 = vld [vmem:[%s3698_s3 + $0x7b0] sm:$0xff]  ;;  %v1226_v34 = vld [vmem:[%s3698_s3 + $0x7c8] sm:$0xff]  ;;  %v2286_v38 = vpack.c.bf16 %v1221_v29, %v1217_v28 }
 0x338   : > { %v2414_v39 = vpack.c.bf16 %v1223_v33, %v1219_v32 }
 0x33a   : > { %2267 = vmatpush1.bf16.msra.mxu0 %v2266_v41  ;;  %2395 = vmatpush1.bf16.msra.mxu1 %v2394_v42  ;;  %v2288_v41 = vpack.c.bf16 %v1230_v35, %v1226_v34  ;;  %v2416_v42 = vpack.c.bf16 %v1232_v37, %v1228_v36 }
 0x33b   : > { %2269 = vmatprep.subr.bf16.mxu0 %v2268_v45  ;;  %2397 = vmatprep.subr.bf16.mxu1 %v2396_v46  ;;  %v1231_v45 = vld [vmem:[%s3698_s3 + $0x7f0] sm:$0xff]  ;;  %v2290_v46 = vpack.c.bf16 %v1229_v43, %v1225_v40 }
 0x33c   : > { %v2418_v47 = vpack.c.bf16 %v1231_v45, %v1227_v44 }
 0x33e   : > { %2271 = vmatpush1.bf16.msra.mxu0 %v2270_v54  ;;  %2399 = vmatpush1.bf16.msra.mxu1 %v2398_v55 }
 0x33f   : > { %2273 = vmatprep.subr.bf16.mxu0 %v2272_v58  ;;  %2401 = vmatprep.subr.bf16.mxu1 %v2400_v59 }
 0x342   : > { %2275 = vmatpush1.bf16.msra.mxu0 %v2274_v2  ;;  %2403 = vmatpush1.bf16.msra.mxu1 %v2402_v3  ;;  %v1524_v2 = vpop.permute.xlu1 %1523  ;;  %v1529_v3 = vpop.permute.xlu0 %1528 }
 0x343   : > { %2277 = vmatprep.subr.bf16.mxu0 %v2276_v6  ;;  %2405 = vmatprep.subr.bf16.mxu1 %v2404_v7 }
 0x346   : > { %2279 = vmatpush1.bf16.msra.mxu0 %v2278_v16  ;;  %2407 = vmatpush1.bf16.msra.mxu1 %v2406_v14  ;;  %v1716_v28 = vpop.permute.xlu1 %1715 }
 0x347   : > { %2281 = vmatprep.subr.bf16.mxu0 %v2280_v22  ;;  %2409 = vmatprep.subr.bf16.mxu1 %v2408_v18 }
 0x34a   : > { %2283 = vmatpush1.bf16.msra.mxu0 %v2282_v23  ;;  %2411 = vmatpush1.bf16.msra.mxu1 %v2410_v27  ;;  %v1711_v27 = vld [vmem:[%s3705_s10] sm:$0xf] }
 0x34b   : > { %2285 = vmatprep.subr.bf16.mxu0 %v2284_v30  ;;  %2413 = vmatprep.subr.bf16.mxu1 %v2412_v31 }
 0x34e   : > { %2287 = vmatpush1.bf16.msra.mxu0 %v2286_v38  ;;  %2415 = vmatpush1.bf16.msra.mxu1 %v2414_v39 }
 0x34f   : > { %2289 = vmatprep.subr.bf16.mxu0 %v2288_v41  ;;  %2417 = vmatprep.subr.bf16.mxu1 %v2416_v42 }
 0x352   : > { %2291 = vmatpush1.bf16.msra.mxu0 %v2290_v46  ;;  %2419 = vmatpush1.bf16.msra.mxu1 %v2418_v47 }
 0x355   : > { %1369 = vmatmul.mubr.f32.vlgmr.msra.gmra.mrb[6].mxu0 %v3638_v48  ;;  %1511 = vmatmul.mubr.f32.vlgmr.msra.gmra.mrb[6].mxu1 %v3638_v48 }
 0x356   : > { %1613 = vmatprep.mubr.f32.mxu0 %v2481_v50  ;;  %1690 = vmatprep.mubr.f32.mxu1 %v2481_v50 }
 0x3a8   : > { %v3644_v49 = vpop.f32.mrb[4].mxu0  ;;  %v3646_v51 = vpop.f32.mrb[4].mxu1 }
 0x3a9   : > { %v3648_v52 = vpop.f32.mrb[5].mxu0  ;;  %v3650_v53 = vpop.f32.mrb[5].mxu1 }
 0x3aa   : > { %v1901_v54 = vcombine.low %v3644_v49, %v3648_v52  ;;  %v1902_v55 = vcombine.low %v3646_v51, %v3650_v53 }
 0x428   : > { %v1370_v56 = vpop.f32.mrb[6].mxu0  ;;  %v1512_v57 = vpop.f32.mrb[6].mxu1 }
 0x429   : > { %v1372_v58 = vpop.f32.mrb[7].mxu0  ;;  %v1514_v59 = vpop.f32.mrb[7].mxu1 }
 0x42a   : > { %1979 = vmatprep.subr.msk.mxu0 %vm647_vm1, %v1372_v58  ;;  %1983 = vmatprep.subr.msk.mxu1 %vm647_vm1, %v1514_v59 }
 0x42b   : > { %1980 = vmatpush1.msk.msra.mxu0 %vm647_vm1, %v1370_v56  ;;  %1984 = vmatpush1.msk.msra.mxu1 %vm647_vm1, %v1512_v57 }
 0x42c   : > { %1981 = vmatmul.mubr.msk.f32.vlgmr.msra.gmra.mrb[8].mxu0 %vm640_vm0, %v1517_v60  ;;  %1985 = vmatmul.mubr.msk.f32.vlgmr.msra.gmra.mrb[8].mxu1 %vm640_vm0, %v1517_v60 }
 0x42d   : > { %1619 = vmatprep.mubr.f32.mxu0 %v2481_v50  ;;  %1696 = vmatprep.mubr.f32.mxu1 %v2481_v50 }
 0x430   : > { %1982 = vmatmul.mubr.msk.f32.gmra.mrb[10].mxu0 %vm640_vm0, %v1518_v61  ;;  %1986 = vmatmul.mubr.msk.f32.gmra.mrb[10].mxu1 %vm640_vm0, %v1518_v61 }
 0x431   : > { %1785 = vmatprep.mubr.f32.mxu0 %v2481_v50  ;;  %1856 = vmatprep.mubr.f32.mxu1 %v2481_v50 }
 0x4ff   : > { %v1615_v62 = vpop.f32.mrb[8].mxu0  ;;  %v1692_v63 = vpop.f32.mrb[8].mxu1 }
 0x500   : > { %v1617_v0 = vpop.f32.mrb[9].mxu0  ;;  %v1694_v1 = vpop.f32.mrb[9].mxu1  ;;  %v1616_v4 = vadd.f32 %v1615_v62, %v1524_v2  ;;  %v1693_v5 = vadd.f32 %v1692_v63, %v1524_v2 }
 0x501   : > { %v1618_v6 = vadd.f32 %v1617_v0, %v1524_v2  ;;  %v1695_v7 = vadd.f32 %v1694_v1, %v1524_v2 }
 0x502   : > { %v1703_v15 = vmax.f32 %v1616_v4, 0.0  ;;  %v1705_v50 = vmax.f32 %v1693_v5, 0.0 }
 0x503   : > { %v1621_v8 = vpop.f32.mrb[10].mxu0  ;;  %v1698_v9 = vpop.f32.mrb[10].mxu1  ;;  %v1704_v18 = vmax.f32 %v1618_v6, 0.0  ;;  %v1706_v19 = vmax.f32 %v1695_v7, 0.0 }
 0x504   : > { %v1622_v10 = vadd.f32 %v1621_v8, %v1529_v3  ;;  %v1699_v11 = vadd.f32 %v1698_v9, %v1529_v3  ;;  %v1623_v12 = vpop.f32.mrb[11].mxu0  ;;  %v1700_v13 = vpop.f32.mrb[11].mxu1 }
 0x505   : > { %v1624_v16 = vadd.f32 %v1623_v12, %v1529_v3  ;;  %v1701_v14 = vadd.f32 %v1700_v13, %v1529_v3  ;;  %v2469_v3 = vld [vmem:[%s2723_s14] sm:$0xff] }
 0x506   : > { %v1707_v17 = vmax.f32 %v1622_v10, 0.0  ;;  %v1709_v22 = vmax.f32 %v1699_v11, 0.0 }
 0x507   : > { %v1708_v20 = vmax.f32 %v1624_v16, 0.0  ;;  %v1710_v21 = vmax.f32 %v1701_v14, 0.0 }
 0x508   : > { %v2422_v24 = vpack.c.bf16 %v1707_v17, %v1703_v15  ;;  %v2426_v25 = vpack.c.bf16 %v1709_v22, %v1705_v50 }
 0x509   : > { %v2420_v26 = vpack.c.bf16 %v1708_v20, %v1704_v18  ;;  %v2424_v23 = vpack.c.bf16 %v1710_v21, %v1706_v19 }
 0x50b   : > { %2421 = vmatprep.subr.bf16.mxu0 %v2420_v26  ;;  %2425 = vmatprep.subr.bf16.mxu1 %v2424_v23 }
 0x50c   : > { %2423 = vmatpush1.bf16.msra.mxu0 %v2422_v24  ;;  %2427 = vmatpush1.bf16.msra.mxu1 %v2426_v25 }
 0x50f   : > { %1987 = vmatmul.mubr.msk.f32.vlgmr.msra.gmra.mrb[12].mxu0 %vm735_vm3, %v1711_v27  ;;  %1988 = vmatmul.mubr.msk.f32.vlgmr.msra.gmra.mrb[12].mxu1 %vm735_vm3, %v1711_v27 }
 0x5e2   : > { %v1787_v29 = vpop.f32.mrb[12].mxu0  ;;  %v1858_v30 = vpop.f32.mrb[12].mxu1 }
 0x5e3   : > { %v1788_v31 = vadd.f32 %v1787_v29, %v1716_v28  ;;  %v1859_v32 = vadd.f32 %v1858_v30, %v1716_v28  ;;  %v1789_v33 = vpop.f32.mrb[13].mxu0  ;;  %v1860_v34 = vpop.f32.mrb[13].mxu1 }
 0x5e4   : > { %v1790_v35 = vadd.f32 %v1789_v33, %v1716_v28  ;;  %v1861_v36 = vadd.f32 %v1860_v34, %v1716_v28 }
 0x5e5   : > { %v1863_v37 = vsub.f32 0.0, %v1788_v31  ;;  %v1865_v38 = vsub.f32 0.0, %v1859_v32 }
 0x5e6   : > { %v1864_v39 = vsub.f32 0.0, %v1790_v35  ;;  %v1866_v40 = vsub.f32 0.0, %v1861_v36 }
 0x5e7   : > { %v1867_v41 = vmul.f32 1.442695, %v1863_v37  ;;  %v1871_v42 = vmul.f32 1.442695, %v1865_v38 }
 0x5e8   : > { %v1869_v43 = vmul.f32 1.442695, %v1864_v39  ;;  %v1873_v44 = vmul.f32 1.442695, %v1866_v40 }
 0x5e9   : > { %2452 = vpow2.f32 %v1867_v41 }
 0x5ea   : > { %2454 = vpow2.f32 %v1871_v42 }
 0x5eb   : > { %2456 = vpow2.f32 %v1869_v43 }
 0x5ec   : > { %2458 = vpow2.f32 %v1873_v44 }
 0x5f3   : > { %v2453_v45 = vpop.eup %2452 }
 0x5f4   : > { %v2455_v46 = vpop.eup %2454  ;;  %v1875_v47 = vadd.f32 1.0, %v2453_v45 }
 0x5f5   : > { %v2457_v56 = vpop.eup %2456  ;;  %v1877_v57 = vadd.f32 1.0, %v2455_v46 }
 0x5f6   : > { %v2459_v58 = vpop.eup %2458  ;;  %2460 = vrcp.f32 %v1875_v47  ;;  %v1876_v59 = vadd.f32 1.0, %v2457_v56 }
 0x5f7   : > { %2462 = vrcp.f32 %v1877_v57  ;;  %v1878_v60 = vadd.f32 1.0, %v2459_v58 }
 0x5f8   : > { %2464 = vrcp.f32 %v1876_v59 }
 0x5f9   : > { %2466 = vrcp.f32 %v1878_v60 }
 0x600   : > { %v2461_v61 = vpop.eup %2460 }
 0x601   : > { %v2463_v62 = vpop.eup %2462 }
 0x602   : > { %v2465_v63 = vpop.eup %2464 }
 0x603   : > { %v2467_v0 = vpop.eup %2466  ;;  %v1891_v1 = vcombine.low %v2461_v61, %v2465_v63 }
 0x604   : > { %v1892_v2 = vcombine.low %v2463_v62, %v2467_v0 }
 0x605   : > { %v1895_v4 = vmul.f32 %v2469_v3, %v1891_v1 }
 0x606   : > { %v1896_v5 = vmul.f32 %v3638_v48, %v1892_v2 }
 0x607   : > { %v1905_v6 = vmul.f32 %v1901_v54, %v1895_v4 }
 0x608   : > { %v1906_v7 = vmul.f32 %v1902_v55, %v1896_v5 }
 0x609   : > { %1907 = vst [vmem:[%s413_s28] sm:$0xff] %v1905_v6 }
 0x60a   : > { %1908 = vst [vmem:[%s413_s28 + $0x8] sm:$0xff] %v1906_v7 }
 0x60b PF: > { %s22_s21 = sadd.s32 1, %s2476_s21  }
 0x60c   : > { %p19_p4 = scmp.ge.s32.totalorder %s22_s21, 4  }
 0x60e   :  { %21 = sbr.rel (!%p19_p4) target bundleno = 1 (0x1), region = 98 }

</bundles_post_ra>
